<compile_context>
chip_gen: v7x
topology: tpu7x:2x2x1
jax: 0.10.0
libtpu: 0.0.40
codegen_flags: <defaults>
</compile_context>

<pallas_src>
import numpy as np
import jax
import jax.numpy as jnp
from jax import lax
from jax.experimental import pallas as pl
from jax.experimental.pallas import tpu as pltpu

# -------------------- configuration (small, forward-consistent) --------------
IN_SIZE = (16, 16)
ZSIZE = 32
A_CH, B_CH, C_CH = 8, 16, 32          # a, b, c channel widths
P = Q = R = 2                         # upsample scale factors
BATCH = 2
H0 = IN_SIZE[0] // (P * Q * R)        # 2
W0 = IN_SIZE[1] // (P * Q * R)        # 2
HW0 = H0 * W0                         # 4
L1_IN = (H0, W0)                      # 2x2 -> 4x4,   c -> c
L2_IN = (2 * H0, 2 * W0)              # 4x4 -> 8x8,   c -> b
L3_IN = (4 * H0, 4 * W0)              # 8x8 -> 16x16, b -> a
HW_OUT = IN_SIZE[0] * IN_SIZE[1]      # 256
LAYER_COUT = (C_CH, B_CH, A_CH)


# ===================== device-aware batch tiling ==============================

def _tensorcores_per_chip():
    # v7x has 2 TensorCores per chip; v5e/v6e have 1.  Default to 1 if unknown.
    try:
        kind = jax.devices()[0].device_kind.lower()
    except Exception:
        return 1
    return 2 if "v7" in kind else 1


def _choose_b_tile(batch, n_tc):
    if n_tc >= 2 and batch >= 2:
        bt = max(1, batch // 2)      # keep a >=2-step "parallel" grid on v7x
    else:
        bt = batch                   # single TC: collapse grid to one step
    while batch % bt:
        bt -= 1
    return max(bt, 1)


# ===================== host-side operator precomputation =====================

def _bilinear_matrix(n_in, scale=2):
    # PyTorch Upsample(mode='bilinear', align_corners=False) source indexing.
    n_out = n_in * scale
    i = np.arange(n_out, dtype=np.float64)
    src = np.maximum((i + 0.5) / scale - 0.5, 0.0)
    x0 = np.minimum(np.floor(src).astype(np.int64), n_in - 1)
    x1 = np.minimum(x0 + 1, n_in - 1)
    frac = src - x0
    M = np.zeros((n_out, n_in), np.float64)
    M[np.arange(n_out), x0] += (1.0 - frac)
    M[np.arange(n_out), x1] += frac
    return M


def _shift_matrix(H, W, dy, dx):
    # S[h_out, h_src] = 1 iff src = (y+dy, x+dx) is in bounds (zero padding).
    S = np.zeros((H * W, H * W), np.float64)
    for y in range(H):
        ys = y + dy
        if not (0 <= ys < H):
            continue
        for x in range(W):
            xs = x + dx
            if 0 <= xs < W:
                S[y * W + x, ys * W + xs] = 1.0
    return S


def _layer_operators(wt, h_in, w_in, b_tile):
    # wt: ConvTranspose2d weight (Cin, Cout, 3, 3).  Layer = Upsample2x -> convT.
    wt = np.asarray(wt, np.float64)
    U = np.kron(_bilinear_matrix(h_in), _bilinear_matrix(w_in))    # (HWo, HWi)
    h_out, w_out = 2 * h_in, 2 * w_in
    ws_rows, a_taps = [], []
    for ky in range(3):
        for kx in range(3):
            S = _shift_matrix(h_out, w_out, ky - 1, kx - 1)
            a_taps.append((S @ U).T)                               # (HWi, HWo)
            # ConvT(k=3,s=1,p=1) == 3x3 "same" conv with spatially flipped taps.
            w_t = wt[:, :, 2 - ky, 2 - kx].T                       # (Cout, Cin)
            # block-diagonal over the stacked batch: rows [b][co], cols [b][ci]
            ws_rows.append(np.kron(np.eye(b_tile), w_t))
    ws = np.concatenate(ws_rows, axis=0)      # (9*BT*Cout, BT*Cin), order [t][b][co]
    at = np.stack(a_taps)                     # (9, HWi, HWo)  (exact in bf16)
    return ws, at


def _build_const_slab(entries, width=128):
    # One lane-dense f32 slab; each section starts at an 8-aligned row offset.
    parts, offs, row = [], {}, 0
    for name, a in entries:
        a = np.asarray(a, np.float64)
        r, c = a.shape
        rp = ((r + 7) // 8) * 8
        blk = np.zeros((rp, width), np.float32)
        blk[:r, :c] = a
        parts.append(blk)
        offs[name] = (row, r, c)
        row += rp
    return np.concatenate(parts, axis=0), offs


def _build_ws_slab(ws_list):
    # One bf16 slab for the 3 channel-mix weights; 16-aligned row offsets.
    width = max(w.shape[1] for w in ws_list)
    parts, offs, row = [], [], 0
    for w in ws_list:
        r, c = w.shape
        rp = ((r + 15) // 16) * 16
        blk = np.zeros((rp, width), np.float32)
        blk[:r, :c] = np.asarray(w, np.float64)
        parts.append(blk)
        offs.append((row, r, c))
        row += rp
    return np.concatenate(parts, axis=0), offs


def pack_params(raw, b_tile):
    BT = b_tile
    lin_w = np.asarray(raw["lin_w"], np.float64)                   # (Z, C*HW0)
    lin_b = np.asarray(raw["lin_b"], np.float64)                   # (C*HW0,)
    # wlk[c, zi*HW0 + j] = lin_w[zi, c*HW0 + j]
    wlk = lin_w.reshape(ZSIZE, C_CH, HW0).transpose(1, 0, 2).reshape(C_CH, ZSIZE * HW0)
    wlk_stack = np.tile(wlk, (BT, 1))                              # (BT*C, Z*HW0)
    sel = np.kron(np.eye(ZSIZE), np.ones((1, HW0)))                # (Z, Z*HW0)
    gath = np.tile(np.eye(HW0), (ZSIZE, 1))                        # (Z*HW0, HW0)
    E = np.kron(np.eye(BT), np.ones((C_CH, 1)))                    # (BT*C, BT)
    blin = np.tile(lin_b.reshape(C_CH, HW0), (BT, 1))              # (BT*C, HW0)

    ws_list, a_list, b_list = [], [], []
    for wt_key, b_key, (hin, win) in (("wt1", "b1", L1_IN),
                                      ("wt2", "b2", L2_IN),
                                      ("wt3", "b3", L3_IN)):
        ws, at = _layer_operators(raw[wt_key], hin, win, BT)
        ws_list.append(ws)
        a_list.append(at)
        b_list.append(np.tile(np.asarray(raw[b_key], np.float64).reshape(-1, 1),
                              (BT, 1)))                            # (BT*Cout, 1)

    w4 = np.asarray(raw["wt4"], np.float64)[:, :, 0, 0].T          # (3, A)
    w4_bd = np.kron(np.eye(BT), w4)                                # (BT*3, BT*A)
    b4 = np.tile(np.asarray(raw["b4"], np.float64).reshape(3, 1), (BT, 1))

    cs, coff = _build_const_slab([
        ("wlk", wlk_stack), ("sel", sel), ("gath", gath), ("E", E),
        ("blin", blin), ("b1", b_list[0]), ("b2", b_list[1]), ("b3", b_list[2]),
        ("w4t", w4_bd), ("b4", b4)])
    ws_slab, ws_off = _build_ws_slab(ws_list)

    params = {
        "cs": jnp.asarray(cs, jnp.float32),
        "ws": jnp.asarray(ws_slab).astype(jnp.bfloat16),
        "a1": jnp.asarray(a_list[0], jnp.float32).astype(jnp.bfloat16),
        "a2": jnp.asarray(a_list[1], jnp.float32).astype(jnp.bfloat16),
        "a3": jnp.asarray(a_list[2], jnp.float32).astype(jnp.bfloat16),
    }
    meta = {"b_tile": BT, "coff": coff, "ws_off": ws_off}
    return params, meta


# ============================== fused Pallas kernel ==========================

def make_decoder_forward(meta):
    BT = meta["b_tile"]
    coff = dict(meta["coff"])
    ws_off = list(meta["ws_off"])
    f32, bf16 = jnp.float32, jnp.bfloat16
    bias_names = ("b1", "b2", "b3")

    def kernel(z_ref, cs_ref, ws_ref, a1_ref, a2_ref, a3_ref, out_ref):
        def cslab(name):
            off, r, c = coff[name]
            return cs_ref[off:off + r, 0:c]         # static, 8-aligned row slice

        # ---- Linear(zsize -> c*HW0) + ReLU, channels-first & batch-stacked ----
        # x[b*C+c, j] = relu( sum_z lin_w[z, c*HW0+j] * z[b, z] + lin_b[c*HW0+j] )
        zblk = z_ref[0]                                              # (BT, Z)
        zsel = jnp.dot(zblk, cslab("sel"), preferred_element_type=f32)   # (BT, Z*HW0)
        zl = jnp.dot(cslab("E"), zsel, preferred_element_type=f32)       # (BT*C, Z*HW0)
        prod = cslab("wlk") * zl
        pre = jnp.dot(prod, cslab("gath"), preferred_element_type=f32)   # (BT*C, HW0)
        x = jnp.maximum(pre + cslab("blin"), 0.0)                        # (BT*C, HW0)

        # ---- 3 x (bilinear 2x upsample + ConvT3x3(pad=1) + ReLU) --------------
        a_refs = (a1_ref, a2_ref, a3_ref)
        for li in range(3):
            woff, wr, wc = ws_off[li]
            ws_l = ws_ref[woff:woff + wr, 0:wc]          # bf16 (9*BT*cout, BT*cin)
            # stacked channel mix (block-diag over batch), rows ordered [t][b][co]
            q = jnp.dot(ws_l, x.astype(bf16), preferred_element_type=f32)
            m = BT * LAYER_COUT[li]
            a_ref = a_refs[li]
            # spatial mix with fused (upsample + shift + zero-pad) operators A_t
            parts = [jnp.dot(q[t * m:(t + 1) * m].astype(bf16), a_ref[t],
                             preferred_element_type=f32) for t in range(9)]
            while len(parts) > 1:                        # pairwise tree reduction
                nxt = [parts[i] + parts[i + 1]
                       for i in range(0, len(parts) - 1, 2)]
                if len(parts) % 2:
                    nxt.append(parts[-1])
                parts = nxt
            x = jnp.maximum(parts[0] + cslab(bias_names[li]), 0.0)  # (BT*cout, HWout)

        # ---- ConvTranspose2d(a, 3, k=1) + Sigmoid -> lane-dense (BT*3, 256) ----
        y = jnp.dot(cslab("w4t"), x, preferred_element_type=f32) + cslab("b4")
        out_ref[0] = pl.reciprocal(1.0 + jnp.exp(-y), approx=True)   # sigmoid (EUP)

    def forward(z, params):
        B = z.shape[0]
        assert B % BT == 0
        G = B // BT
        z3 = z.reshape(G, BT, ZSIZE).astype(jnp.float32)
        cs, ws = params["cs"], params["ws"]
        a1, a2, a3 = params["a1"], params["a2"], params["a3"]
        out = pl.pallas_call(
            kernel,
            out_shape=jax.ShapeDtypeStruct((G, 3 * BT, HW_OUT), jnp.float32),
            grid=(G,),
            in_specs=[
                pl.BlockSpec((1, BT, ZSIZE), lambda i: (i, 0, 0)),
                pl.BlockSpec(cs.shape, lambda i: (0, 0)),
                pl.BlockSpec(ws.shape, lambda i: (0, 0)),
                pl.BlockSpec(a1.shape, lambda i: (0, 0, 0)),
                pl.BlockSpec(a2.shape, lambda i: (0, 0, 0)),
                pl.BlockSpec(a3.shape, lambda i: (0, 0, 0)),
            ],
            out_specs=pl.BlockSpec((1, 3 * BT, HW_OUT), lambda i: (i, 0, 0)),
            compiler_params=pltpu.CompilerParams(
                dimension_semantics=("parallel",)),
        )(z3, cs, ws, a1, a2, a3)
        # (G, BT*3, 256) -> NCHW image; pure reshape, no transpose.
        return out.reshape(B, 3, IN_SIZE[0], IN_SIZE[1])

    return forward


# ===================== pure-JAX reference (XLA, independent path) ============

def reference_forward(z, raw):
    h = jax.nn.relu(z @ raw["lin_w"] + raw["lin_b"][None, :])
    x = h.reshape(z.shape[0], C_CH, H0, W0)
    for wt, bv in ((raw["wt1"], raw["b1"]),
                   (raw["wt2"], raw["b2"]),
                   (raw["wt3"], raw["b3"])):
        n, ch, hh, ww = x.shape
        x = jax.image.resize(x, (n, ch, 2 * hh, 2 * ww), method="bilinear")
        w_oihw = jnp.transpose(jnp.flip(wt, (2, 3)), (1, 0, 2, 3))
        x = lax.conv_general_dilated(x, w_oihw, (1, 1), "SAME",
                                     dimension_numbers=("NCHW", "OIHW", "NCHW"))
        x = jax.nn.relu(x + bv.reshape(1, -1, 1, 1))
    y = jnp.einsum("bahw,ad->bdhw", x, raw["wt4"][:, :, 0, 0])
    y = y + raw["b4"].reshape(1, 3, 1, 1)
    return jax.nn.sigmoid(y)


# ============================== main =========================================

if __name__ == "__main__":
    key = jax.random.PRNGKey(0)
    ks = jax.random.split(key, 11)

    def init(k, shape, scale=0.1):
        return scale * jax.random.normal(k, shape, dtype=jnp.float32)

    F = C_CH * HW0   # 128 linear output features

    raw = {
        "lin_w": init(ks[0], (ZSIZE, F)),
        "lin_b": init(ks[1], (F,)),
        "wt1": init(ks[2], (C_CH, C_CH, 3, 3)), "b1": init(ks[3], (C_CH,)),
        "wt2": init(ks[4], (C_CH, B_CH, 3, 3)), "b2": init(ks[5], (B_CH,)),
        "wt3": init(ks[6], (B_CH, A_CH, 3, 3)), "b3": init(ks[7], (A_CH,)),
        "wt4": init(ks[8], (A_CH, 3, 1, 1)),    "b4": init(ks[9], (3,)),
    }
    z = jax.random.normal(ks[10], (BATCH, ZSIZE), dtype=jnp.float32)

    b_tile = _choose_b_tile(BATCH, _tensorcores_per_chip())
    params, meta = pack_params(raw, b_tile)

    fwd = jax.jit(make_decoder_forward(meta))
    out = jax.block_until_ready(fwd(z, params))

    assert out.shape == (BATCH, 3, IN_SIZE[0], IN_SIZE[1])
    assert bool(jnp.all(jnp.isfinite(out)))

    ref = reference_forward(z, raw)
    err = float(jnp.max(jnp.abs(out - ref)))
    assert err < 2e-2, f"mismatch vs reference: {err}"

    print("KERNEL_OK")
</pallas_src>

<mosaic_0001>
module attributes {stable_mosaic.version = 11 : i64} {
  func.func @kernel(%arg0: i32, %arg1: memref<1x2x32xf32, #tpu.memory_space<vmem>>, %arg2: memref<480x128xf32, #tpu.memory_space<vmem>>, %arg3: memref<1008x64xbf16, #tpu.memory_space<vmem>>, %arg4: memref<9x4x16xbf16, #tpu.memory_space<vmem>>, %arg5: memref<9x16x64xbf16, #tpu.memory_space<vmem>>, %arg6: memref<9x64x256xbf16, #tpu.memory_space<vmem>>, %arg7: memref<1x6x256xf32, #tpu.memory_space<vmem>>) attributes {dimension_semantics = [#tpu.dimension_semantics<parallel>], iteration_bounds = array<i64: 1>, scalar_prefetch = 0 : i64, scratch_operands = 0 : i64, tpu.core_type = #tpu.core_type<tc>, window_params = [{transform_indices = @transform_0, window_bounds = array<i64: 1, 2, 32>}, {pipeline_mode = #tpu.pipeline_mode<synchronous>, transform_indices = @transform_1, window_bounds = array<i64: 480, 128>}, {pipeline_mode = #tpu.pipeline_mode<synchronous>, transform_indices = @transform_2, window_bounds = array<i64: 1008, 64>}, {pipeline_mode = #tpu.pipeline_mode<synchronous>, transform_indices = @transform_3, window_bounds = array<i64: 9, 4, 16>}, {pipeline_mode = #tpu.pipeline_mode<synchronous>, transform_indices = @transform_4, window_bounds = array<i64: 9, 16, 64>}, {pipeline_mode = #tpu.pipeline_mode<synchronous>, transform_indices = @transform_5, window_bounds = array<i64: 9, 64, 256>}, {transform_indices = @transform_6, window_bounds = array<i64: 1, 6, 256>}]} {
    %c0 = arith.constant 0 : index
    %c0_0 = arith.constant 0 : index
    %c0_1 = arith.constant 0 : index
    %0 = vector.load %arg1[%c0, %c0_0, %c0_1] : memref<1x2x32xf32, #tpu.memory_space<vmem>>, vector<1x2x32xf32>
    %1 = vector.shape_cast %0 : vector<1x2x32xf32> to vector<2x32xf32>
    %c64 = arith.constant 64 : index
    %c0_2 = arith.constant 0 : index
    %2 = vector.load %arg2[%c64, %c0_2] : memref<480x128xf32, #tpu.memory_space<vmem>>, vector<32x128xf32>
    %cst = arith.constant dense<0.000000e+00> : vector<2x128xf32>
    %3 = tpu.matmul %1, %2, %cst {dimension_numbers = #tpu.dot_dimension_numbers<[1], [0], [0], [1], [0, 0, 1, 1], [], []>} : vector<2x32xf32>, vector<32x128xf32>, vector<2x128xf32> -> vector<2x128xf32>
    %c224 = arith.constant 224 : index
    %c0_3 = arith.constant 0 : index
    %4 = vector.load %arg2[%c224, %c0_3] : memref<480x128xf32, #tpu.memory_space<vmem>>, vector<64x2xf32>
    %cst_4 = arith.constant dense<0.000000e+00> : vector<64x128xf32>
    %5 = tpu.matmul %4, %3, %cst_4 {dimension_numbers = #tpu.dot_dimension_numbers<[1], [0], [0], [1], [0, 0, 1, 1], [], []>} : vector<64x2xf32>, vector<2x128xf32>, vector<64x128xf32> -> vector<64x128xf32>
    %c0_5 = arith.constant 0 : index
    %c0_6 = arith.constant 0 : index
    %6 = vector.load %arg2[%c0_5, %c0_6] : memref<480x128xf32, #tpu.memory_space<vmem>>, vector<64x128xf32>
    %7 = arith.mulf %6, %5 : vector<64x128xf32>
    %c96 = arith.constant 96 : index
    %c0_7 = arith.constant 0 : index
    %8 = vector.load %arg2[%c96, %c0_7] : memref<480x128xf32, #tpu.memory_space<vmem>>, vector<128x4xf32>
    %cst_8 = arith.constant dense<0.000000e+00> : vector<64x4xf32>
    %9 = tpu.matmul %7, %8, %cst_8 {dimension_numbers = #tpu.dot_dimension_numbers<[1], [0], [0], [1], [0, 0, 1, 1], [], []>} : vector<64x128xf32>, vector<128x4xf32>, vector<64x4xf32> -> vector<64x4xf32>
    %c288 = arith.constant 288 : index
    %c0_9 = arith.constant 0 : index
    %10 = vector.load %arg2[%c288, %c0_9] : memref<480x128xf32, #tpu.memory_space<vmem>>, vector<64x4xf32>
    %11 = arith.addf %9, %10 : vector<64x4xf32>
    %cst_10 = arith.constant 0.000000e+00 : f32
    %12 = vector.broadcast %cst_10 : f32 to vector<64x4xf32>
    %13 = arith.maximumf %11, %12 : vector<64x4xf32>
    %c0_11 = arith.constant 0 : index
    %c0_12 = arith.constant 0 : index
    %14 = vector.load %arg3[%c0_11, %c0_12] : memref<1008x64xbf16, #tpu.memory_space<vmem>>, vector<576x64xbf16>
    %15 = arith.truncf %13 : vector<64x4xf32> to vector<64x4xbf16>
    %cst_13 = arith.constant dense<0.000000e+00> : vector<576x4xf32>
    %16 = tpu.matmul %14, %15, %cst_13 {dimension_numbers = #tpu.dot_dimension_numbers<[1], [0], [0], [1], [0, 0, 1, 1], [], []>} : vector<576x64xbf16>, vector<64x4xbf16>, vector<576x4xf32> -> vector<576x4xf32>
    %17 = vector.extract_strided_slice %16 {offsets = [0, 0], sizes = [64, 4], strides = [1, 1]} : vector<576x4xf32> to vector<64x4xf32>
    %18 = arith.truncf %17 : vector<64x4xf32> to vector<64x4xbf16>
    %c0_14 = arith.constant 0 : index
    %c0_15 = arith.constant 0 : index
    %c0_16 = arith.constant 0 : index
    %19 = vector.load %arg4[%c0_14, %c0_15, %c0_16] : memref<9x4x16xbf16, #tpu.memory_space<vmem>>, vector<1x4x16xbf16>
    %20 = vector.shape_cast %19 : vector<1x4x16xbf16> to vector<4x16xbf16>
    %cst_17 = arith.constant dense<0.000000e+00> : vector<64x16xf32>
    %21 = tpu.matmul %18, %20, %cst_17 {dimension_numbers = #tpu.dot_dimension_numbers<[1], [0], [0], [1], [0, 0, 1, 1], [], []>} : vector<64x4xbf16>, vector<4x16xbf16>, vector<64x16xf32> -> vector<64x16xf32>
    %22 = vector.extract_strided_slice %16 {offsets = [64, 0], sizes = [64, 4], strides = [1, 1]} : vector<576x4xf32> to vector<64x4xf32>
    %23 = arith.truncf %22 : vector<64x4xf32> to vector<64x4xbf16>
    %c1 = arith.constant 1 : index
    %c0_18 = arith.constant 0 : index
    %c0_19 = arith.constant 0 : index
    %24 = vector.load %arg4[%c1, %c0_18, %c0_19] : memref<9x4x16xbf16, #tpu.memory_space<vmem>>, vector<1x4x16xbf16>
    %25 = vector.shape_cast %24 : vector<1x4x16xbf16> to vector<4x16xbf16>
    %cst_20 = arith.constant dense<0.000000e+00> : vector<64x16xf32>
    %26 = tpu.matmul %23, %25, %cst_20 {dimension_numbers = #tpu.dot_dimension_numbers<[1], [0], [0], [1], [0, 0, 1, 1], [], []>} : vector<64x4xbf16>, vector<4x16xbf16>, vector<64x16xf32> -> vector<64x16xf32>
    %27 = vector.extract_strided_slice %16 {offsets = [128, 0], sizes = [64, 4], strides = [1, 1]} : vector<576x4xf32> to vector<64x4xf32>
    %28 = arith.truncf %27 : vector<64x4xf32> to vector<64x4xbf16>
    %c2 = arith.constant 2 : index
    %c0_21 = arith.constant 0 : index
    %c0_22 = arith.constant 0 : index
    %29 = vector.load %arg4[%c2, %c0_21, %c0_22] : memref<9x4x16xbf16, #tpu.memory_space<vmem>>, vector<1x4x16xbf16>
    %30 = vector.shape_cast %29 : vector<1x4x16xbf16> to vector<4x16xbf16>
    %cst_23 = arith.constant dense<0.000000e+00> : vector<64x16xf32>
    %31 = tpu.matmul %28, %30, %cst_23 {dimension_numbers = #tpu.dot_dimension_numbers<[1], [0], [0], [1], [0, 0, 1, 1], [], []>} : vector<64x4xbf16>, vector<4x16xbf16>, vector<64x16xf32> -> vector<64x16xf32>
    %32 = vector.extract_strided_slice %16 {offsets = [192, 0], sizes = [64, 4], strides = [1, 1]} : vector<576x4xf32> to vector<64x4xf32>
    %33 = arith.truncf %32 : vector<64x4xf32> to vector<64x4xbf16>
    %c3 = arith.constant 3 : index
    %c0_24 = arith.constant 0 : index
    %c0_25 = arith.constant 0 : index
    %34 = vector.load %arg4[%c3, %c0_24, %c0_25] : memref<9x4x16xbf16, #tpu.memory_space<vmem>>, vector<1x4x16xbf16>
    %35 = vector.shape_cast %34 : vector<1x4x16xbf16> to vector<4x16xbf16>
    %cst_26 = arith.constant dense<0.000000e+00> : vector<64x16xf32>
    %36 = tpu.matmul %33, %35, %cst_26 {dimension_numbers = #tpu.dot_dimension_numbers<[1], [0], [0], [1], [0, 0, 1, 1], [], []>} : vector<64x4xbf16>, vector<4x16xbf16>, vector<64x16xf32> -> vector<64x16xf32>
    %37 = vector.extract_strided_slice %16 {offsets = [256, 0], sizes = [64, 4], strides = [1, 1]} : vector<576x4xf32> to vector<64x4xf32>
    %38 = arith.truncf %37 : vector<64x4xf32> to vector<64x4xbf16>
    %c4 = arith.constant 4 : index
    %c0_27 = arith.constant 0 : index
    %c0_28 = arith.constant 0 : index
    %39 = vector.load %arg4[%c4, %c0_27, %c0_28] : memref<9x4x16xbf16, #tpu.memory_space<vmem>>, vector<1x4x16xbf16>
    %40 = vector.shape_cast %39 : vector<1x4x16xbf16> to vector<4x16xbf16>
    %cst_29 = arith.constant dense<0.000000e+00> : vector<64x16xf32>
    %41 = tpu.matmul %38, %40, %cst_29 {dimension_numbers = #tpu.dot_dimension_numbers<[1], [0], [0], [1], [0, 0, 1, 1], [], []>} : vector<64x4xbf16>, vector<4x16xbf16>, vector<64x16xf32> -> vector<64x16xf32>
    %42 = vector.extract_strided_slice %16 {offsets = [320, 0], sizes = [64, 4], strides = [1, 1]} : vector<576x4xf32> to vector<64x4xf32>
    %43 = arith.truncf %42 : vector<64x4xf32> to vector<64x4xbf16>
    %c5 = arith.constant 5 : index
    %c0_30 = arith.constant 0 : index
    %c0_31 = arith.constant 0 : index
    %44 = vector.load %arg4[%c5, %c0_30, %c0_31] : memref<9x4x16xbf16, #tpu.memory_space<vmem>>, vector<1x4x16xbf16>
    %45 = vector.shape_cast %44 : vector<1x4x16xbf16> to vector<4x16xbf16>
    %cst_32 = arith.constant dense<0.000000e+00> : vector<64x16xf32>
    %46 = tpu.matmul %43, %45, %cst_32 {dimension_numbers = #tpu.dot_dimension_numbers<[1], [0], [0], [1], [0, 0, 1, 1], [], []>} : vector<64x4xbf16>, vector<4x16xbf16>, vector<64x16xf32> -> vector<64x16xf32>
    %47 = vector.extract_strided_slice %16 {offsets = [384, 0], sizes = [64, 4], strides = [1, 1]} : vector<576x4xf32> to vector<64x4xf32>
    %48 = arith.truncf %47 : vector<64x4xf32> to vector<64x4xbf16>
    %c6 = arith.constant 6 : index
    %c0_33 = arith.constant 0 : index
    %c0_34 = arith.constant 0 : index
    %49 = vector.load %arg4[%c6, %c0_33, %c0_34] : memref<9x4x16xbf16, #tpu.memory_space<vmem>>, vector<1x4x16xbf16>
    %50 = vector.shape_cast %49 : vector<1x4x16xbf16> to vector<4x16xbf16>
    %cst_35 = arith.constant dense<0.000000e+00> : vector<64x16xf32>
    %51 = tpu.matmul %48, %50, %cst_35 {dimension_numbers = #tpu.dot_dimension_numbers<[1], [0], [0], [1], [0, 0, 1, 1], [], []>} : vector<64x4xbf16>, vector<4x16xbf16>, vector<64x16xf32> -> vector<64x16xf32>
    %52 = vector.extract_strided_slice %16 {offsets = [448, 0], sizes = [64, 4], strides = [1, 1]} : vector<576x4xf32> to vector<64x4xf32>
    %53 = arith.truncf %52 : vector<64x4xf32> to vector<64x4xbf16>
    %c7 = arith.constant 7 : index
    %c0_36 = arith.constant 0 : index
    %c0_37 = arith.constant 0 : index
    %54 = vector.load %arg4[%c7, %c0_36, %c0_37] : memref<9x4x16xbf16, #tpu.memory_space<vmem>>, vector<1x4x16xbf16>
    %55 = vector.shape_cast %54 : vector<1x4x16xbf16> to vector<4x16xbf16>
    %cst_38 = arith.constant dense<0.000000e+00> : vector<64x16xf32>
    %56 = tpu.matmul %53, %55, %cst_38 {dimension_numbers = #tpu.dot_dimension_numbers<[1], [0], [0], [1], [0, 0, 1, 1], [], []>} : vector<64x4xbf16>, vector<4x16xbf16>, vector<64x16xf32> -> vector<64x16xf32>
    %57 = vector.extract_strided_slice %16 {offsets = [512, 0], sizes = [64, 4], strides = [1, 1]} : vector<576x4xf32> to vector<64x4xf32>
    %58 = arith.truncf %57 : vector<64x4xf32> to vector<64x4xbf16>
    %c8 = arith.constant 8 : index
    %c0_39 = arith.constant 0 : index
    %c0_40 = arith.constant 0 : index
    %59 = vector.load %arg4[%c8, %c0_39, %c0_40] : memref<9x4x16xbf16, #tpu.memory_space<vmem>>, vector<1x4x16xbf16>
    %60 = vector.shape_cast %59 : vector<1x4x16xbf16> to vector<4x16xbf16>
    %cst_41 = arith.constant dense<0.000000e+00> : vector<64x16xf32>
    %61 = tpu.matmul %58, %60, %cst_41 {dimension_numbers = #tpu.dot_dimension_numbers<[1], [0], [0], [1], [0, 0, 1, 1], [], []>} : vector<64x4xbf16>, vector<4x16xbf16>, vector<64x16xf32> -> vector<64x16xf32>
    %62 = arith.addf %21, %26 : vector<64x16xf32>
    %63 = arith.addf %31, %36 : vector<64x16xf32>
    %64 = arith.addf %41, %46 : vector<64x16xf32>
    %65 = arith.addf %51, %56 : vector<64x16xf32>
    %66 = arith.addf %62, %63 : vector<64x16xf32>
    %67 = arith.addf %64, %65 : vector<64x16xf32>
    %68 = arith.addf %66, %67 : vector<64x16xf32>
    %69 = arith.addf %68, %61 : vector<64x16xf32>
    %c352 = arith.constant 352 : index
    %c0_42 = arith.constant 0 : index
    %70 = vector.load %arg2[%c352, %c0_42] : memref<480x128xf32, #tpu.memory_space<vmem>>, vector<64x1xf32>
    %71 = vector.broadcast %70 : vector<64x1xf32> to vector<64x16xf32>
    %72 = arith.addf %69, %71 : vector<64x16xf32>
    %cst_43 = arith.constant 0.000000e+00 : f32
    %73 = vector.broadcast %cst_43 : f32 to vector<64x16xf32>
    %74 = arith.maximumf %72, %73 : vector<64x16xf32>
    %c576 = arith.constant 576 : index
    %c0_44 = arith.constant 0 : index
    %75 = vector.load %arg3[%c576, %c0_44] : memref<1008x64xbf16, #tpu.memory_space<vmem>>, vector<288x64xbf16>
    %76 = arith.truncf %74 : vector<64x16xf32> to vector<64x16xbf16>
    %cst_45 = arith.constant dense<0.000000e+00> : vector<288x16xf32>
    %77 = tpu.matmul %75, %76, %cst_45 {dimension_numbers = #tpu.dot_dimension_numbers<[1], [0], [0], [1], [0, 0, 1, 1], [], []>} : vector<288x64xbf16>, vector<64x16xbf16>, vector<288x16xf32> -> vector<288x16xf32>
    %78 = vector.extract_strided_slice %77 {offsets = [0, 0], sizes = [32, 16], strides = [1, 1]} : vector<288x16xf32> to vector<32x16xf32>
    %79 = arith.truncf %78 : vector<32x16xf32> to vector<32x16xbf16>
    %c0_46 = arith.constant 0 : index
    %c0_47 = arith.constant 0 : index
    %c0_48 = arith.constant 0 : index
    %80 = vector.load %arg5[%c0_46, %c0_47, %c0_48] : memref<9x16x64xbf16, #tpu.memory_space<vmem>>, vector<1x16x64xbf16>
    %81 = vector.shape_cast %80 : vector<1x16x64xbf16> to vector<16x64xbf16>
    %cst_49 = arith.constant dense<0.000000e+00> : vector<32x64xf32>
    %82 = tpu.matmul %79, %81, %cst_49 {dimension_numbers = #tpu.dot_dimension_numbers<[1], [0], [0], [1], [0, 0, 1, 1], [], []>} : vector<32x16xbf16>, vector<16x64xbf16>, vector<32x64xf32> -> vector<32x64xf32>
    %83 = vector.extract_strided_slice %77 {offsets = [32, 0], sizes = [32, 16], strides = [1, 1]} : vector<288x16xf32> to vector<32x16xf32>
    %84 = arith.truncf %83 : vector<32x16xf32> to vector<32x16xbf16>
    %c1_50 = arith.constant 1 : index
    %c0_51 = arith.constant 0 : index
    %c0_52 = arith.constant 0 : index
    %85 = vector.load %arg5[%c1_50, %c0_51, %c0_52] : memref<9x16x64xbf16, #tpu.memory_space<vmem>>, vector<1x16x64xbf16>
    %86 = vector.shape_cast %85 : vector<1x16x64xbf16> to vector<16x64xbf16>
    %cst_53 = arith.constant dense<0.000000e+00> : vector<32x64xf32>
    %87 = tpu.matmul %84, %86, %cst_53 {dimension_numbers = #tpu.dot_dimension_numbers<[1], [0], [0], [1], [0, 0, 1, 1], [], []>} : vector<32x16xbf16>, vector<16x64xbf16>, vector<32x64xf32> -> vector<32x64xf32>
    %88 = vector.extract_strided_slice %77 {offsets = [64, 0], sizes = [32, 16], strides = [1, 1]} : vector<288x16xf32> to vector<32x16xf32>
    %89 = arith.truncf %88 : vector<32x16xf32> to vector<32x16xbf16>
    %c2_54 = arith.constant 2 : index
    %c0_55 = arith.constant 0 : index
    %c0_56 = arith.constant 0 : index
    %90 = vector.load %arg5[%c2_54, %c0_55, %c0_56] : memref<9x16x64xbf16, #tpu.memory_space<vmem>>, vector<1x16x64xbf16>
    %91 = vector.shape_cast %90 : vector<1x16x64xbf16> to vector<16x64xbf16>
    %cst_57 = arith.constant dense<0.000000e+00> : vector<32x64xf32>
    %92 = tpu.matmul %89, %91, %cst_57 {dimension_numbers = #tpu.dot_dimension_numbers<[1], [0], [0], [1], [0, 0, 1, 1], [], []>} : vector<32x16xbf16>, vector<16x64xbf16>, vector<32x64xf32> -> vector<32x64xf32>
    %93 = vector.extract_strided_slice %77 {offsets = [96, 0], sizes = [32, 16], strides = [1, 1]} : vector<288x16xf32> to vector<32x16xf32>
    %94 = arith.truncf %93 : vector<32x16xf32> to vector<32x16xbf16>
    %c3_58 = arith.constant 3 : index
    %c0_59 = arith.constant 0 : index
    %c0_60 = arith.constant 0 : index
    %95 = vector.load %arg5[%c3_58, %c0_59, %c0_60] : memref<9x16x64xbf16, #tpu.memory_space<vmem>>, vector<1x16x64xbf16>
    %96 = vector.shape_cast %95 : vector<1x16x64xbf16> to vector<16x64xbf16>
    %cst_61 = arith.constant dense<0.000000e+00> : vector<32x64xf32>
    %97 = tpu.matmul %94, %96, %cst_61 {dimension_numbers = #tpu.dot_dimension_numbers<[1], [0], [0], [1], [0, 0, 1, 1], [], []>} : vector<32x16xbf16>, vector<16x64xbf16>, vector<32x64xf32> -> vector<32x64xf32>
    %98 = vector.extract_strided_slice %77 {offsets = [128, 0], sizes = [32, 16], strides = [1, 1]} : vector<288x16xf32> to vector<32x16xf32>
    %99 = arith.truncf %98 : vector<32x16xf32> to vector<32x16xbf16>
    %c4_62 = arith.constant 4 : index
    %c0_63 = arith.constant 0 : index
    %c0_64 = arith.constant 0 : index
    %100 = vector.load %arg5[%c4_62, %c0_63, %c0_64] : memref<9x16x64xbf16, #tpu.memory_space<vmem>>, vector<1x16x64xbf16>
    %101 = vector.shape_cast %100 : vector<1x16x64xbf16> to vector<16x64xbf16>
    %cst_65 = arith.constant dense<0.000000e+00> : vector<32x64xf32>
    %102 = tpu.matmul %99, %101, %cst_65 {dimension_numbers = #tpu.dot_dimension_numbers<[1], [0], [0], [1], [0, 0, 1, 1], [], []>} : vector<32x16xbf16>, vector<16x64xbf16>, vector<32x64xf32> -> vector<32x64xf32>
    %103 = vector.extract_strided_slice %77 {offsets = [160, 0], sizes = [32, 16], strides = [1, 1]} : vector<288x16xf32> to vector<32x16xf32>
    %104 = arith.truncf %103 : vector<32x16xf32> to vector<32x16xbf16>
    %c5_66 = arith.constant 5 : index
    %c0_67 = arith.constant 0 : index
    %c0_68 = arith.constant 0 : index
    %105 = vector.load %arg5[%c5_66, %c0_67, %c0_68] : memref<9x16x64xbf16, #tpu.memory_space<vmem>>, vector<1x16x64xbf16>
    %106 = vector.shape_cast %105 : vector<1x16x64xbf16> to vector<16x64xbf16>
    %cst_69 = arith.constant dense<0.000000e+00> : vector<32x64xf32>
    %107 = tpu.matmul %104, %106, %cst_69 {dimension_numbers = #tpu.dot_dimension_numbers<[1], [0], [0], [1], [0, 0, 1, 1], [], []>} : vector<32x16xbf16>, vector<16x64xbf16>, vector<32x64xf32> -> vector<32x64xf32>
    %108 = vector.extract_strided_slice %77 {offsets = [192, 0], sizes = [32, 16], strides = [1, 1]} : vector<288x16xf32> to vector<32x16xf32>
    %109 = arith.truncf %108 : vector<32x16xf32> to vector<32x16xbf16>
    %c6_70 = arith.constant 6 : index
    %c0_71 = arith.constant 0 : index
    %c0_72 = arith.constant 0 : index
    %110 = vector.load %arg5[%c6_70, %c0_71, %c0_72] : memref<9x16x64xbf16, #tpu.memory_space<vmem>>, vector<1x16x64xbf16>
    %111 = vector.shape_cast %110 : vector<1x16x64xbf16> to vector<16x64xbf16>
    %cst_73 = arith.constant dense<0.000000e+00> : vector<32x64xf32>
    %112 = tpu.matmul %109, %111, %cst_73 {dimension_numbers = #tpu.dot_dimension_numbers<[1], [0], [0], [1], [0, 0, 1, 1], [], []>} : vector<32x16xbf16>, vector<16x64xbf16>, vector<32x64xf32> -> vector<32x64xf32>
    %113 = vector.extract_strided_slice %77 {offsets = [224, 0], sizes = [32, 16], strides = [1, 1]} : vector<288x16xf32> to vector<32x16xf32>
    %114 = arith.truncf %113 : vector<32x16xf32> to vector<32x16xbf16>
    %c7_74 = arith.constant 7 : index
    %c0_75 = arith.constant 0 : index
    %c0_76 = arith.constant 0 : index
    %115 = vector.load %arg5[%c7_74, %c0_75, %c0_76] : memref<9x16x64xbf16, #tpu.memory_space<vmem>>, vector<1x16x64xbf16>
    %116 = vector.shape_cast %115 : vector<1x16x64xbf16> to vector<16x64xbf16>
    %cst_77 = arith.constant dense<0.000000e+00> : vector<32x64xf32>
    %117 = tpu.matmul %114, %116, %cst_77 {dimension_numbers = #tpu.dot_dimension_numbers<[1], [0], [0], [1], [0, 0, 1, 1], [], []>} : vector<32x16xbf16>, vector<16x64xbf16>, vector<32x64xf32> -> vector<32x64xf32>
    %118 = vector.extract_strided_slice %77 {offsets = [256, 0], sizes = [32, 16], strides = [1, 1]} : vector<288x16xf32> to vector<32x16xf32>
    %119 = arith.truncf %118 : vector<32x16xf32> to vector<32x16xbf16>
    %c8_78 = arith.constant 8 : index
    %c0_79 = arith.constant 0 : index
    %c0_80 = arith.constant 0 : index
    %120 = vector.load %arg5[%c8_78, %c0_79, %c0_80] : memref<9x16x64xbf16, #tpu.memory_space<vmem>>, vector<1x16x64xbf16>
    %121 = vector.shape_cast %120 : vector<1x16x64xbf16> to vector<16x64xbf16>
    %cst_81 = arith.constant dense<0.000000e+00> : vector<32x64xf32>
    %122 = tpu.matmul %119, %121, %cst_81 {dimension_numbers = #tpu.dot_dimension_numbers<[1], [0], [0], [1], [0, 0, 1, 1], [], []>} : vector<32x16xbf16>, vector<16x64xbf16>, vector<32x64xf32> -> vector<32x64xf32>
    %123 = arith.addf %82, %87 : vector<32x64xf32>
    %124 = arith.addf %92, %97 : vector<32x64xf32>
    %125 = arith.addf %102, %107 : vector<32x64xf32>
    %126 = arith.addf %112, %117 : vector<32x64xf32>
    %127 = arith.addf %123, %124 : vector<32x64xf32>
    %128 = arith.addf %125, %126 : vector<32x64xf32>
    %129 = arith.addf %127, %128 : vector<32x64xf32>
    %130 = arith.addf %129, %122 : vector<32x64xf32>
    %c416 = arith.constant 416 : index
    %c0_82 = arith.constant 0 : index
    %131 = vector.load %arg2[%c416, %c0_82] : memref<480x128xf32, #tpu.memory_space<vmem>>, vector<32x1xf32>
    %132 = vector.broadcast %131 : vector<32x1xf32> to vector<32x64xf32>
    %133 = arith.addf %130, %132 : vector<32x64xf32>
    %cst_83 = arith.constant 0.000000e+00 : f32
    %134 = vector.broadcast %cst_83 : f32 to vector<32x64xf32>
    %135 = arith.maximumf %133, %134 : vector<32x64xf32>
    %c864 = arith.constant 864 : index
    %c0_84 = arith.constant 0 : index
    %136 = vector.load %arg3[%c864, %c0_84] : memref<1008x64xbf16, #tpu.memory_space<vmem>>, vector<144x32xbf16>
    %137 = arith.truncf %135 : vector<32x64xf32> to vector<32x64xbf16>
    %cst_85 = arith.constant dense<0.000000e+00> : vector<144x64xf32>
    %138 = tpu.matmul %136, %137, %cst_85 {dimension_numbers = #tpu.dot_dimension_numbers<[1], [0], [0], [1], [0, 0, 1, 1], [], []>} : vector<144x32xbf16>, vector<32x64xbf16>, vector<144x64xf32> -> vector<144x64xf32>
    %139 = vector.extract_strided_slice %138 {offsets = [0, 0], sizes = [16, 64], strides = [1, 1]} : vector<144x64xf32> to vector<16x64xf32>
    %140 = arith.truncf %139 : vector<16x64xf32> to vector<16x64xbf16>
    %c0_86 = arith.constant 0 : index
    %c0_87 = arith.constant 0 : index
    %c0_88 = arith.constant 0 : index
    %141 = vector.load %arg6[%c0_86, %c0_87, %c0_88] : memref<9x64x256xbf16, #tpu.memory_space<vmem>>, vector<1x64x256xbf16>
    %142 = vector.shape_cast %141 : vector<1x64x256xbf16> to vector<64x256xbf16>
    %cst_89 = arith.constant dense<0.000000e+00> : vector<16x256xf32>
    %143 = tpu.matmul %140, %142, %cst_89 {dimension_numbers = #tpu.dot_dimension_numbers<[1], [0], [0], [1], [0, 0, 1, 1], [], []>} : vector<16x64xbf16>, vector<64x256xbf16>, vector<16x256xf32> -> vector<16x256xf32>
    %144 = vector.extract_strided_slice %138 {offsets = [16, 0], sizes = [16, 64], strides = [1, 1]} : vector<144x64xf32> to vector<16x64xf32>
    %145 = arith.truncf %144 : vector<16x64xf32> to vector<16x64xbf16>
    %c1_90 = arith.constant 1 : index
    %c0_91 = arith.constant 0 : index
    %c0_92 = arith.constant 0 : index
    %146 = vector.load %arg6[%c1_90, %c0_91, %c0_92] : memref<9x64x256xbf16, #tpu.memory_space<vmem>>, vector<1x64x256xbf16>
    %147 = vector.shape_cast %146 : vector<1x64x256xbf16> to vector<64x256xbf16>
    %cst_93 = arith.constant dense<0.000000e+00> : vector<16x256xf32>
    %148 = tpu.matmul %145, %147, %cst_93 {dimension_numbers = #tpu.dot_dimension_numbers<[1], [0], [0], [1], [0, 0, 1, 1], [], []>} : vector<16x64xbf16>, vector<64x256xbf16>, vector<16x256xf32> -> vector<16x256xf32>
    %149 = vector.extract_strided_slice %138 {offsets = [32, 0], sizes = [16, 64], strides = [1, 1]} : vector<144x64xf32> to vector<16x64xf32>
    %150 = arith.truncf %149 : vector<16x64xf32> to vector<16x64xbf16>
    %c2_94 = arith.constant 2 : index
    %c0_95 = arith.constant 0 : index
    %c0_96 = arith.constant 0 : index
    %151 = vector.load %arg6[%c2_94, %c0_95, %c0_96] : memref<9x64x256xbf16, #tpu.memory_space<vmem>>, vector<1x64x256xbf16>
    %152 = vector.shape_cast %151 : vector<1x64x256xbf16> to vector<64x256xbf16>
    %cst_97 = arith.constant dense<0.000000e+00> : vector<16x256xf32>
    %153 = tpu.matmul %150, %152, %cst_97 {dimension_numbers = #tpu.dot_dimension_numbers<[1], [0], [0], [1], [0, 0, 1, 1], [], []>} : vector<16x64xbf16>, vector<64x256xbf16>, vector<16x256xf32> -> vector<16x256xf32>
    %154 = vector.extract_strided_slice %138 {offsets = [48, 0], sizes = [16, 64], strides = [1, 1]} : vector<144x64xf32> to vector<16x64xf32>
    %155 = arith.truncf %154 : vector<16x64xf32> to vector<16x64xbf16>
    %c3_98 = arith.constant 3 : index
    %c0_99 = arith.constant 0 : index
    %c0_100 = arith.constant 0 : index
    %156 = vector.load %arg6[%c3_98, %c0_99, %c0_100] : memref<9x64x256xbf16, #tpu.memory_space<vmem>>, vector<1x64x256xbf16>
    %157 = vector.shape_cast %156 : vector<1x64x256xbf16> to vector<64x256xbf16>
    %cst_101 = arith.constant dense<0.000000e+00> : vector<16x256xf32>
    %158 = tpu.matmul %155, %157, %cst_101 {dimension_numbers = #tpu.dot_dimension_numbers<[1], [0], [0], [1], [0, 0, 1, 1], [], []>} : vector<16x64xbf16>, vector<64x256xbf16>, vector<16x256xf32> -> vector<16x256xf32>
    %159 = vector.extract_strided_slice %138 {offsets = [64, 0], sizes = [16, 64], strides = [1, 1]} : vector<144x64xf32> to vector<16x64xf32>
    %160 = arith.truncf %159 : vector<16x64xf32> to vector<16x64xbf16>
    %c4_102 = arith.constant 4 : index
    %c0_103 = arith.constant 0 : index
    %c0_104 = arith.constant 0 : index
    %161 = vector.load %arg6[%c4_102, %c0_103, %c0_104] : memref<9x64x256xbf16, #tpu.memory_space<vmem>>, vector<1x64x256xbf16>
    %162 = vector.shape_cast %161 : vector<1x64x256xbf16> to vector<64x256xbf16>
    %cst_105 = arith.constant dense<0.000000e+00> : vector<16x256xf32>
    %163 = tpu.matmul %160, %162, %cst_105 {dimension_numbers = #tpu.dot_dimension_numbers<[1], [0], [0], [1], [0, 0, 1, 1], [], []>} : vector<16x64xbf16>, vector<64x256xbf16>, vector<16x256xf32> -> vector<16x256xf32>
    %164 = vector.extract_strided_slice %138 {offsets = [80, 0], sizes = [16, 64], strides = [1, 1]} : vector<144x64xf32> to vector<16x64xf32>
    %165 = arith.truncf %164 : vector<16x64xf32> to vector<16x64xbf16>
    %c5_106 = arith.constant 5 : index
    %c0_107 = arith.constant 0 : index
    %c0_108 = arith.constant 0 : index
    %166 = vector.load %arg6[%c5_106, %c0_107, %c0_108] : memref<9x64x256xbf16, #tpu.memory_space<vmem>>, vector<1x64x256xbf16>
    %167 = vector.shape_cast %166 : vector<1x64x256xbf16> to vector<64x256xbf16>
    %cst_109 = arith.constant dense<0.000000e+00> : vector<16x256xf32>
    %168 = tpu.matmul %165, %167, %cst_109 {dimension_numbers = #tpu.dot_dimension_numbers<[1], [0], [0], [1], [0, 0, 1, 1], [], []>} : vector<16x64xbf16>, vector<64x256xbf16>, vector<16x256xf32> -> vector<16x256xf32>
    %169 = vector.extract_strided_slice %138 {offsets = [96, 0], sizes = [16, 64], strides = [1, 1]} : vector<144x64xf32> to vector<16x64xf32>
    %170 = arith.truncf %169 : vector<16x64xf32> to vector<16x64xbf16>
    %c6_110 = arith.constant 6 : index
    %c0_111 = arith.constant 0 : index
    %c0_112 = arith.constant 0 : index
    %171 = vector.load %arg6[%c6_110, %c0_111, %c0_112] : memref<9x64x256xbf16, #tpu.memory_space<vmem>>, vector<1x64x256xbf16>
    %172 = vector.shape_cast %171 : vector<1x64x256xbf16> to vector<64x256xbf16>
    %cst_113 = arith.constant dense<0.000000e+00> : vector<16x256xf32>
    %173 = tpu.matmul %170, %172, %cst_113 {dimension_numbers = #tpu.dot_dimension_numbers<[1], [0], [0], [1], [0, 0, 1, 1], [], []>} : vector<16x64xbf16>, vector<64x256xbf16>, vector<16x256xf32> -> vector<16x256xf32>
    %174 = vector.extract_strided_slice %138 {offsets = [112, 0], sizes = [16, 64], strides = [1, 1]} : vector<144x64xf32> to vector<16x64xf32>
    %175 = arith.truncf %174 : vector<16x64xf32> to vector<16x64xbf16>
    %c7_114 = arith.constant 7 : index
    %c0_115 = arith.constant 0 : index
    %c0_116 = arith.constant 0 : index
    %176 = vector.load %arg6[%c7_114, %c0_115, %c0_116] : memref<9x64x256xbf16, #tpu.memory_space<vmem>>, vector<1x64x256xbf16>
    %177 = vector.shape_cast %176 : vector<1x64x256xbf16> to vector<64x256xbf16>
    %cst_117 = arith.constant dense<0.000000e+00> : vector<16x256xf32>
    %178 = tpu.matmul %175, %177, %cst_117 {dimension_numbers = #tpu.dot_dimension_numbers<[1], [0], [0], [1], [0, 0, 1, 1], [], []>} : vector<16x64xbf16>, vector<64x256xbf16>, vector<16x256xf32> -> vector<16x256xf32>
    %179 = vector.extract_strided_slice %138 {offsets = [128, 0], sizes = [16, 64], strides = [1, 1]} : vector<144x64xf32> to vector<16x64xf32>
    %180 = arith.truncf %179 : vector<16x64xf32> to vector<16x64xbf16>
    %c8_118 = arith.constant 8 : index
    %c0_119 = arith.constant 0 : index
    %c0_120 = arith.constant 0 : index
    %181 = vector.load %arg6[%c8_118, %c0_119, %c0_120] : memref<9x64x256xbf16, #tpu.memory_space<vmem>>, vector<1x64x256xbf16>
    %182 = vector.shape_cast %181 : vector<1x64x256xbf16> to vector<64x256xbf16>
    %cst_121 = arith.constant dense<0.000000e+00> : vector<16x256xf32>
    %183 = tpu.matmul %180, %182, %cst_121 {dimension_numbers = #tpu.dot_dimension_numbers<[1], [0], [0], [1], [0, 0, 1, 1], [], []>} : vector<16x64xbf16>, vector<64x256xbf16>, vector<16x256xf32> -> vector<16x256xf32>
    %184 = arith.addf %143, %148 : vector<16x256xf32>
    %185 = arith.addf %153, %158 : vector<16x256xf32>
    %186 = arith.addf %163, %168 : vector<16x256xf32>
    %187 = arith.addf %173, %178 : vector<16x256xf32>
    %188 = arith.addf %184, %185 : vector<16x256xf32>
    %189 = arith.addf %186, %187 : vector<16x256xf32>
    %190 = arith.addf %188, %189 : vector<16x256xf32>
    %191 = arith.addf %190, %183 : vector<16x256xf32>
    %c448 = arith.constant 448 : index
    %c0_122 = arith.constant 0 : index
    %192 = vector.load %arg2[%c448, %c0_122] : memref<480x128xf32, #tpu.memory_space<vmem>>, vector<16x1xf32>
    %193 = vector.broadcast %192 : vector<16x1xf32> to vector<16x256xf32>
    %194 = arith.addf %191, %193 : vector<16x256xf32>
    %cst_123 = arith.constant 0.000000e+00 : f32
    %195 = vector.broadcast %cst_123 : f32 to vector<16x256xf32>
    %196 = arith.maximumf %194, %195 : vector<16x256xf32>
    %c464 = arith.constant 464 : index
    %c0_124 = arith.constant 0 : index
    %197 = vector.load %arg2[%c464, %c0_124] : memref<480x128xf32, #tpu.memory_space<vmem>>, vector<6x16xf32>
    %cst_125 = arith.constant dense<0.000000e+00> : vector<6x256xf32>
    %198 = tpu.matmul %197, %196, %cst_125 {dimension_numbers = #tpu.dot_dimension_numbers<[1], [0], [0], [1], [0, 0, 1, 1], [], []>} : vector<6x16xf32>, vector<16x256xf32>, vector<6x256xf32> -> vector<6x256xf32>
    %c472 = arith.constant 472 : index
    %c0_126 = arith.constant 0 : index
    %199 = vector.load %arg2[%c472, %c0_126] : memref<480x128xf32, #tpu.memory_space<vmem>>, vector<6x1xf32>
    %200 = vector.broadcast %199 : vector<6x1xf32> to vector<6x256xf32>
    %201 = arith.addf %198, %200 : vector<6x256xf32>
    %cst_127 = arith.constant 0.000000e+00 : f32
    %202 = vector.broadcast %cst_127 : f32 to vector<6x256xf32>
    %203 = arith.subf %202, %201 : vector<6x256xf32>
    %204 = math.exp %203 : vector<6x256xf32>
    %cst_128 = arith.constant 1.000000e+00 : f32
    %205 = vector.broadcast %cst_128 : f32 to vector<6x256xf32>
    %206 = arith.addf %205, %204 : vector<6x256xf32>
    %207 = tpu.reciprocal %206 {approx = true} : vector<6x256xf32> -> vector<6x256xf32>
    %c0_129 = arith.constant 0 : index
    %c0_130 = arith.constant 0 : index
    %c0_131 = arith.constant 0 : index
    %208 = vector.load %arg7[%c0_129, %c0_130, %c0_131] : memref<1x6x256xf32, #tpu.memory_space<vmem>>, vector<1x6x256xf32>
    %209 = vector.shape_cast %208 : vector<1x6x256xf32> to vector<6x256xf32>
    %210 = vector.shape_cast %207 : vector<6x256xf32> to vector<1x6x256xf32>
    tpu.vector_store %arg7[%c0_129, %c0_130, %c0_131], %210 {strides = array<i32>} : memref<1x6x256xf32, #tpu.memory_space<vmem>>, vector<1x6x256xf32>,
    return
  }
  func.func @transform_0(%arg0: i32) -> (i32, i32, i32) {
    %c0_i32 = arith.constant 0 : i32
    %c0_i32_0 = arith.constant 0 : i32
    %c0_i32_1 = arith.constant 0 : i32
    return %arg0, %c0_i32, %c0_i32_0 : i32, i32, i32
  }
  func.func @transform_1(%arg0: i32) -> (i32, i32) {
    %c0_i32 = arith.constant 0 : i32
    %c0_i32_0 = arith.constant 0 : i32
    %c0_i32_1 = arith.constant 0 : i32
    return %c0_i32, %c0_i32_0 : i32, i32
  }
  func.func @transform_2(%arg0: i32) -> (i32, i32) {
    %c0_i32 = arith.constant 0 : i32
    %c0_i32_0 = arith.constant 0 : i32
    %c0_i32_1 = arith.constant 0 : i32
    return %c0_i32, %c0_i32_0 : i32, i32
  }
  func.func @transform_3(%arg0: i32) -> (i32, i32, i32) {
    %c0_i32 = arith.constant 0 : i32
    %c0_i32_0 = arith.constant 0 : i32
    %c0_i32_1 = arith.constant 0 : i32
    %c0_i32_2 = arith.constant 0 : i32
    return %c0_i32, %c0_i32_0, %c0_i32_1 : i32, i32, i32
  }
  func.func @transform_4(%arg0: i32) -> (i32, i32, i32) {
    %c0_i32 = arith.constant 0 : i32
    %c0_i32_0 = arith.constant 0 : i32
    %c0_i32_1 = arith.constant 0 : i32
    %c0_i32_2 = arith.constant 0 : i32
    return %c0_i32, %c0_i32_0, %c0_i32_1 : i32, i32, i32
  }
  func.func @transform_5(%arg0: i32) -> (i32, i32, i32) {
    %c0_i32 = arith.constant 0 : i32
    %c0_i32_0 = arith.constant 0 : i32
    %c0_i32_1 = arith.constant 0 : i32
    %c0_i32_2 = arith.constant 0 : i32
    return %c0_i32, %c0_i32_0, %c0_i32_1 : i32, i32, i32
  }
  func.func @transform_6(%arg0: i32) -> (i32, i32, i32) {
    %c0_i32 = arith.constant 0 : i32
    %c0_i32_0 = arith.constant 0 : i32
    %c0_i32_1 = arith.constant 0 : i32
    return %arg0, %c0_i32, %c0_i32_0 : i32, i32, i32
  }
}

</mosaic_0001>

<bundles_post_ra>
// kernel: forward.1
= control target key start
LH: loop header
LB: loop body
LE: loop exit
PB: predicated region body
PF: predicated region fallthrough
CT: control target
= control target key end

     0   :  { %11 = vsyncpa [#allocation3], 0  ;;  %s5494_s21 = smov [#allocation2]   ;;  %s6416_s0 = inlined_call_operand.vmem [shape: f32[1,2,32], index: 0, kind: input, shape index: {}]   ;;  %s6417_s1 = inlined_call_operand.hbm [shape: f32[480,128], index: 1, kind: input, shape index: {}]   ;;  %s6418_s2 = inlined_call_operand.vmem [shape: bf16[1008,64], index: 2, kind: input, shape index: {}]   ;;  %s6419_s3 = inlined_call_operand.vmem [shape: bf16[9,4,16], index: 3, kind: input, shape index: {}]   ;;  %s6420_s4 = inlined_call_operand.vmem [shape: bf16[9,16,64], index: 4, kind: input, shape index: {}]   ;;  %s6421_s5 = inlined_call_operand.vmem [shape: bf16[9,64,256], index: 5, kind: input, shape index: {}]   ;;  %s6422_s6 = inlined_call_operand.vmem [shape: f32[1,6,256], index: 6, kind: output, shape index: {}]  }
   0x1   :  { %s19_s22 = sshll.u32 %s5494_s21, 4  ;;  %s5470_s25 = scalar_lea.hbm %s6417_s1, 7680  ;;  %s20_s22 = int_to_ptr.vmem [resolvable:$true] %s19_s22 }
   0x2   :  { %p5471_p0 = scmp.ne.s32.totalorder %s6417_s1, %s5470_s25  ;;  %p5474_p1 = scmp.lt.u32.totalorder %s5470_s25, %s6417_s1 }
   0x4   :  { %p5476_p2 = pnand %p5474_p1, %p5471_p0 }
   0x6   :  { %5479 = shalt.err (!%p5476_p2)
}
   0x7   :  { %s5480_s30 = scalar_lea.vmem %s20_s22, 7680  ;;  %p5485_p4 = scmp.lt.s32.totalorder %s20_s22, %s20_s22 }
   0x8   :  { %p5481_p3 = scmp.ne.s32.totalorder %s20_s22, %s5480_s30  ;;  %p5486_p5 = scmp.lt.s32.totalorder %s5480_s30, %s5480_s30 }
   0xa   :  { %p5487_p6 = por %p5486_p5, %p5485_p4 }
   0xc   :  { %p5488_p7 = pnand %p5487_p6, %p5481_p3 }
   0xe   :  { %5491 = shalt.err (!%p5488_p7)
}
   0xf   :  { %s5495_s7 = smov 128   ;;  %s5496_s8 = smov 8  }
  0x10   :  { %25 = dma.hbm_to_vmem [thread:$0]  %s6417_s1, 7680, %s20_s22, [#allocation3], %s5495_s7, %s5495_s7, %s5496_s8  }
  0x11   :  { %5492 = dma.done.wait [#allocation3], 7680  }
  0x12   :  { %5493 = vsyncadd [#allocation3], 4294959616  ;;  %v5497_v0 = vmov 0.0|0.0   ;;  %vm5498_vm0 = vmmov 0   ;;  %v5499_v1 = vmov 0.0   ;;  %v39_v2 = vld [vmem:[#allocation2 + $0x40] sm:$0xff] }
  0x13   :  { %5094 = vmatprep.subr.bf16.mxu1 %v5497_v0  ;;  %4725 = vmatprep.mubr.msk.f32.mxu1 %vm5498_vm0, %v5499_v1  ;;  %v40_v3 = vld [vmem:[#allocation2 + $0x48] sm:$0xff]  ;;  %v41_v4 = vld [vmem:[#allocation2 + $0x50] sm:$0xff]  ;;  %v42_v6 = vld [vmem:[#allocation2 + $0x58] sm:$0xff]  ;;  %vm43_vm1 = vcmask 261120   ;;  %vm125_vm2 = vcmask 15360   ;;  %vm150_vm3 = vcmask 1041408  }
  0x14   :  { %v5095_v5 = vpack.c.bf16 %v40_v3, %v39_v2  ;;  %v5098_v7 = vpack.c.bf16 %v42_v6, %v41_v4  ;;  %v38_v8 = vld [vmem:[%s6416_s0] sm:$0x3]  ;;  %v276_v11 = vld [vmem:[#allocation2 + $0x68] sm:$0xff]  ;;  %v277_v12 = vld [vmem:[#allocation2 + $0x70] sm:$0xff]  ;;  %vm668_vm4 = vcmask 523264   ;;  %vm1109_vm5 = vcmask 31744  }
  0x15   :  { %v117_v9 = vld [vmem:[#allocation2 + $0xe0] sm:$0xff]  ;;  %v278_v13 = vld [vmem:[#allocation2 + $0x78] sm:$0xff]  ;;  %v118_v16 = vld [vmem:[#allocation2 + $0xe8] sm:$0xff]  ;;  %vm2344_vm6 = vcmask 130048  }
  0x16   :  { %5096 = vmatpush3.bf16.msra.mxu1 %v5095_v5  ;;  %4730 = vmatprep.mubr.msk.f32.mxu0 %vm125_vm2, %v117_v9  ;;  %v275_v10 = vld [vmem:[#allocation2 + $0x60] sm:$0xff]  ;;  %v119_v18 = vld [vmem:[#allocation2 + $0xf0] sm:$0xff]  ;;  %v5104_v19 = vpack.c.bf16 %v278_v13, %v277_v12  ;;  %v280_v21 = vld [vmem:[#allocation2 + $0x88] sm:$0xff] }
  0x17   :  { %5097 = vmatprep.subr.bf16.mxu1 %v5497_v0  ;;  %v5100_v14 = vpack.c.bf16 %v276_v11, %v275_v10  ;;  %v279_v20 = vld [vmem:[#allocation2 + $0x80] sm:$0xff]  ;;  %v120_v22 = vld [vmem:[#allocation2 + $0xf8] sm:$0xff]  ;;  %v281_v25 = vld [vmem:[#allocation2 + $0x90] sm:$0xff] }
  0x18   :  { %v121_v23 = vld [vmem:[#allocation2 + $0x100] sm:$0xff]  ;;  %v5108_v24 = vpack.c.bf16 %v280_v21, %v279_v20  ;;  %v282_v26 = vld [vmem:[#allocation2 + $0x98] sm:$0xff]  ;;  %v122_v27 = vld [vmem:[#allocation2 + $0x108] sm:$0xff] }
  0x19   :  { %v123_v28 = vld [vmem:[#allocation2 + $0x110] sm:$0xff]  ;;  %v5112_v29 = vpack.c.bf16 %v282_v26, %v281_v25  ;;  %v283_v30 = vld [vmem:[#allocation2 + $0xa0] sm:$0xff]  ;;  %v284_v31 = vld [vmem:[#allocation2 + $0xa8] sm:$0xff] }
  0x1a   :  { %5099 = vmatpush3.bf16.msra.mxu1 %v5098_v7  ;;  %v124_v32 = vld [vmem:[#allocation2 + $0x118] sm:$0xff]  ;;  %v5116_v33 = vpack.c.bf16 %v284_v31, %v283_v30  ;;  %v285_v34 = vld [vmem:[#allocation2 + $0xb0] sm:$0xff]  ;;  %v287_v37 = vld [vmem:[#allocation2 + $0xc0] sm:$0xff] }
  0x1b   :  { %v286_v35 = vld [vmem:[#allocation2 + $0xb8] sm:$0xff]  ;;  %v288_v38 = vld [vmem:[#allocation2 + $0xc8] sm:$0xff]  ;;  %v289_v40 = vld [vmem:[#allocation2 + $0xd0] sm:$0xff] }
  0x1c   :  { %v5120_v36 = vpack.c.bf16 %v286_v35, %v285_v34  ;;  %v5124_v39 = vpack.c.bf16 %v288_v38, %v287_v37  ;;  %v290_v41 = vld [vmem:[#allocation2 + $0xd8] sm:$0xff]  ;;  %v259_v43 = vld [vmem:[#allocation2] sm:$0xff]  ;;  %v260_v45 = vld [vmem:[#allocation2 + $0x8] sm:$0xff] }
  0x1d   :  { %4726 = vmatmul.mubr.msk.f32.vlgmr.msra.gmra.mrb[0].mxu1 %vm43_vm1, %v38_v8  ;;  %v5128_v42 = vpack.c.bf16 %v290_v41, %v289_v40  ;;  %v261_v49 = vld [vmem:[#allocation2 + $0x10] sm:$0xff]  ;;  %v262_v51 = vld [vmem:[#allocation2 + $0x18] sm:$0xff]  ;;  %v263_v55 = vld [vmem:[#allocation2 + $0x20] sm:$0xff] }
  0x1e   :  { %v264_v57 = vld [vmem:[#allocation2 + $0x28] sm:$0xff]  ;;  %v265_v61 = vld [vmem:[#allocation2 + $0x30] sm:$0xff]  ;;  %v266_v63 = vld [vmem:[#allocation2 + $0x38] sm:$0xff] }
  0x1f   :  { %v5282_v4 = vld [vmem:[%s6418_s2] sm:$0xff]   ;;  %v292_v5 = vld [vmem:[#allocation2 + $0x128] sm:$0xff]  ;;  %v294_v11 = vld [vmem:[#allocation2 + $0x138] sm:$0xff] }
  0x20   :  { %v291_v6 = vld [vmem:[#allocation2 + $0x120] sm:$0xff]  ;;  %v293_v13 = vld [vmem:[#allocation2 + $0x130] sm:$0xff]  ;;  %v296_v20 = vld [vmem:[#allocation2 + $0x148] sm:$0xff] }
  0x21   :  { %v297_v31 = vld [vmem:[#allocation2 + $0x150] sm:$0xff]  ;;  %v5283_v41 = vld [vmem:[%s6418_s2 + $0x8] sm:$0xff]  }
  0xf0   :  { %v113_v15 = vpop.f32.mrb[0].mxu1 }
  0xf1   :  { %v4727_v17 = vpop.f32.mrb[1].mxu1  ;;  %4728 = vmatprep.subr.msk.mxu0 %vm150_vm3, %v113_v15 }
  0xf2   :  { %4729 = vmatpush3.msk.msra.mxu0 %vm150_vm3, %v113_v15 }
  0xf3   :  { %4731 = vmatmul.mubr.msk.f32.vlgmr.msra.gmra.mrb[0].mxu0 %vm125_vm2, %v118_v16  ;;  %5101 = vmatprep.subr.bf16.mxu0 %v5100_v14 }
  0xf4   :  { %4733 = vmatprep.mubr.msk.f32.mxu0 %vm125_vm2, %v119_v18  ;;  %5103 = vmatpush3.bf16.msra.mxu0 %v5100_v14 }
  0xf5   :  { %5105 = vmatprep.subr.bf16.mxu0 %v5104_v19 }
  0xf7   :  { %4734 = vmatmul.mubr.msk.f32.gmra.mrb[2].mxu0 %vm125_vm2, %v120_v22  ;;  %v295_v22 = vld [vmem:[#allocation2 + $0x140] sm:$0xff] }
  0xf8   :  { %4736 = vmatprep.mubr.msk.f32.mxu0 %vm125_vm2, %v121_v23  ;;  %5107 = vmatpush3.bf16.msra.mxu0 %v5104_v19 }
  0xf9   :  { %5109 = vmatprep.subr.bf16.mxu0 %v5108_v24 }
  0xfb   :  { %4737 = vmatmul.mubr.msk.f32.gmra.mrb[4].mxu0 %vm125_vm2, %v122_v27 }
  0xfc   :  { %4739 = vmatprep.mubr.msk.f32.mxu0 %vm125_vm2, %v123_v28  ;;  %5111 = vmatpush3.bf16.msra.mxu0 %v5108_v24 }
  0xfd   :  { %5113 = vmatprep.subr.bf16.mxu0 %v5112_v29 }
  0xff   :  { %4740 = vmatmul.mubr.msk.f32.gmra.mrb[6].mxu0 %vm125_vm2, %v124_v32 }
 0x100   :  { %5115 = vmatpush3.bf16.msra.mxu0 %v5112_v29  ;;  %v298_v29 = vld [vmem:[#allocation2 + $0x158] sm:$0xff] }
 0x101   :  { %5117 = vmatprep.subr.bf16.mxu0 %v5116_v33 }
 0x104   :  { %5119 = vmatpush3.bf16.msra.mxu0 %v5116_v33 }
 0x105   :  { %5121 = vmatprep.subr.bf16.mxu0 %v5120_v36 }
 0x108   :  { %5123 = vmatpush3.bf16.msra.mxu0 %v5120_v36 }
 0x109   :  { %5125 = vmatprep.subr.bf16.mxu0 %v5124_v39 }
 0x10c   :  { %5127 = vmatpush3.bf16.msra.mxu0 %v5124_v39 }
 0x10d   :  { %5129 = vmatprep.subr.bf16.mxu0 %v5128_v42 }
 0x110   :  { %5131 = vmatpush3.bf16.msra.mxu0 %v5128_v42  ;;  %v5284_v42 = vld [vmem:[%s6418_s2 + $0x10] sm:$0xff]  }
 0x1c6   :  { %v4732_v44 = vpop.f32.mrb[0].mxu0 }
 0x1c7   :  { %v220_v46 = vpop.f32.mrb[1].mxu0  ;;  %v268_v48 = vmul.f32 %v4732_v44, %v260_v45  ;;  %v5286_v44 = vld [vmem:[%s6418_s2 + $0x20] sm:$0xff]   ;;  %v5287_v45 = vld [vmem:[%s6418_s2 + $0x28] sm:$0xff]  }
 0x1c8   :  { %v267_v47 = vmul.f32 %v259_v43, %v220_v46  ;;  %v5285_v43 = vld [vmem:[%s6418_s2 + $0x18] sm:$0xff]   ;;  %v5288_v46 = vld [vmem:[%s6418_s2 + $0x30] sm:$0xff]  }
 0x1ca   :  { %v4735_v50 = vpop.f32.mrb[2].mxu0  ;;  %4774 = vmatprep.mubr.f32.mxu0 %v267_v47  ;;  %v5289_v47 = vld [vmem:[%s6418_s2 + $0x38] sm:$0xff]  }
 0x1cb   :  { %v230_v52 = vpop.f32.mrb[3].mxu0  ;;  %4775 = vmatmul.mubr.f32.vlgmr.msra.gmra.mrb[8].mxu0 %v268_v48  ;;  %v270_v54 = vmul.f32 %v4735_v50, %v262_v51  ;;  %v5290_v48 = vld [vmem:[%s6418_s2 + $0x40] sm:$0xff]   ;;  %v5292_v50 = vld [vmem:[%s6418_s2 + $0x50] sm:$0xff]   ;;  %v5293_v51 = vld [vmem:[%s6418_s2 + $0x58] sm:$0xff]  }
 0x1cc   :  { %v269_v53 = vmul.f32 %v261_v49, %v230_v52  ;;  %v5291_v49 = vld [vmem:[%s6418_s2 + $0x48] sm:$0xff]   ;;  %v5294_v52 = vld [vmem:[%s6418_s2 + $0x60] sm:$0xff]  }
 0x1ce   :  { %v4738_v56 = vpop.f32.mrb[4].mxu0  ;;  %4777 = vmatprep.mubr.f32.mxu0 %v269_v53  ;;  %v5295_v53 = vld [vmem:[%s6418_s2 + $0x68] sm:$0xff]  }
 0x1cf   :  { %v240_v58 = vpop.f32.mrb[5].mxu0  ;;  %4778 = vmatmul.mubr.f32.gmra.mrb[10].mxu0 %v270_v54  ;;  %v272_v60 = vmul.f32 %v4738_v56, %v264_v57  ;;  %v5296_v54 = vld [vmem:[%s6418_s2 + $0x70] sm:$0xff]   ;;  %v5298_v56 = vld [vmem:[%s6418_s2 + $0x80] sm:$0xff]   ;;  %v5299_v57 = vld [vmem:[%s6418_s2 + $0x88] sm:$0xff]  }
 0x1d0   :  { %v271_v59 = vmul.f32 %v263_v55, %v240_v58  ;;  %v5297_v55 = vld [vmem:[%s6418_s2 + $0x78] sm:$0xff]   ;;  %v5300_v58 = vld [vmem:[%s6418_s2 + $0x90] sm:$0xff]  }
 0x1d2   :  { %v4741_v62 = vpop.f32.mrb[6].mxu0  ;;  %4780 = vmatprep.mubr.f32.mxu0 %v271_v59  ;;  %v5301_v59 = vld [vmem:[%s6418_s2 + $0x98] sm:$0xff]  }
 0x1d3   :  { %v250_v0 = vpop.f32.mrb[7].mxu0  ;;  %4781 = vmatmul.mubr.f32.gmra.mrb[12].mxu0 %v272_v60  ;;  %v274_v3 = vmul.f32 %v4741_v62, %v266_v63  ;;  %v5302_v60 = vld [vmem:[%s6418_s2 + $0xa0] sm:$0xff]   ;;  %v5304_v62 = vld [vmem:[%s6418_s2 + $0xb0] sm:$0xff]   ;;  %v5305_v63 = vld [vmem:[%s6418_s2 + $0xb8] sm:$0xff]  }
 0x1d4   :  { %v273_v2 = vmul.f32 %v265_v61, %v250_v0  ;;  %v5303_v61 = vld [vmem:[%s6418_s2 + $0xa8] sm:$0xff]   ;;  %v5306_v0 = vld [vmem:[%s6418_s2 + $0xc0] sm:$0xff]  }
 0x1d6   :  { %4783 = vmatprep.mubr.f32.mxu0 %v273_v2  ;;  %v5307_v2 = vld [vmem:[%s6418_s2 + $0xc8] sm:$0xff]  }
 0x1d7   :  { %4784 = vmatmul.mubr.f32.gmra.mrb[14].mxu0 %v274_v3  ;;  %v5308_v3 = vld [vmem:[%s6418_s2 + $0xd0] sm:$0xff]  }
 0x1d8   :  { %4794 = vmatprep.mubr.msk.bf16.mxu0 %vm668_vm4, %v5282_v4  ;;  %v5309_v4 = vld [vmem:[%s6418_s2 + $0xd8] sm:$0xff]  }
 0x29e   :  { %v4776_v7 = vpop.f32.mrb[8].mxu0 }
 0x29f   :  { %v371_v8 = vadd.f32 %v4776_v7, %v292_v5  ;;  %v365_v9 = vpop.f32.mrb[9].mxu0  ;;  %v5310_v5 = vld [vmem:[%s6418_s2 + $0xe0] sm:$0xff]  }
 0x2a0   :  { %v366_v10 = vadd.f32 %v365_v9, %v291_v6  ;;  %v4247_v6 = vld [vmem:[%s6419_s3 + $0x2] sm:$0x3]  ;;  %v5312_v9 = vld [vmem:[%s6418_s2 + $0xf0] sm:$0xff]  }
 0x2a1   :  { %v405_v12 = vmax.f32 %v371_v8, 0.0  ;;  %5264 = vmatprep.subr.msk.bf16.mxu1 %vm150_vm3, %v4247_v6  ;;  %v1123_v7 = vsel %vm150_vm3, %v4247_v6, 0  ;;  %v5311_v8 = vld [vmem:[%s6418_s2 + $0xe8] sm:$0xff]  }
 0x2a2   :  { %v404_v14 = vmax.f32 %v366_v10, 0.0  ;;  %v4779_v15 = vpop.f32.mrb[10].mxu0  ;;  %4867 = vmatpush3.bf16.msra.mxu1 %v1123_v7  ;;  %v5313_v10 = vld [vmem:[%s6418_s2 + $0xf8] sm:$0xff]  }
 0x2a3   :  { %v381_v16 = vadd.f32 %v4779_v15, %v294_v11  ;;  %v375_v17 = vpop.f32.mrb[11].mxu0  ;;  %v5314_v11 = vld [vmem:[%s6418_s2 + $0x100] sm:$0xff]  }
 0x2a4   :  { %v484_v18 = vpack.c.bf16 %v405_v12, %v404_v14  ;;  %v376_v19 = vadd.f32 %v375_v17, %v293_v13  ;;  %v5315_v12 = vld [vmem:[%s6418_s2 + $0x108] sm:$0xff]   ;;  %v5316_v13 = vld [vmem:[%s6418_s2 + $0x110] sm:$0xff]   ;;  %v5317_v14 = vld [vmem:[%s6418_s2 + $0x118] sm:$0xff]  }
 0x2a5   :  { %v407_v21 = vmax.f32 %v381_v16, 0.0  ;;  %v4253_v15 = vld [vmem:[%s6419_s3 + $0x6] sm:$0x3] }
 0x2a6   :  { %v406_v23 = vmax.f32 %v376_v19, 0.0  ;;  %v4782_v24 = vpop.f32.mrb[12].mxu0  ;;  %4786 = vmatprep.subr.bf16.mxu0 %v484_v18  ;;  %5265 = vmatprep.subr.msk.bf16.mxu1 %vm150_vm3, %v4253_v15 }
 0x2a7   :  { %v391_v25 = vadd.f32 %v4782_v24, %v296_v20  ;;  %v385_v26 = vpop.f32.mrb[13].mxu0  ;;  %4787 = vmatpush3.bf16.msra.mxu0 %v484_v18 }
 0x2a8   :  { %v485_v27 = vpack.c.bf16 %v407_v21, %v406_v23  ;;  %v386_v28 = vadd.f32 %v385_v26, %v295_v22 }
 0x2a9   :  { %v409_v30 = vmax.f32 %v391_v25, 0.0 }
 0x2aa   :  { %v408_v32 = vmax.f32 %v386_v28, 0.0  ;;  %v4785_v33 = vpop.f32.mrb[14].mxu0  ;;  %4788 = vmatprep.subr.bf16.mxu0 %v485_v27 }
 0x2ab   :  { %v401_v34 = vadd.f32 %v4785_v33, %v298_v29  ;;  %v395_v35 = vpop.f32.mrb[15].mxu0  ;;  %4789 = vmatpush3.bf16.msra.mxu0 %v485_v27 }
 0x2ac   :  { %v486_v36 = vpack.c.bf16 %v409_v30, %v408_v32  ;;  %v396_v37 = vadd.f32 %v395_v35, %v297_v31  ;;  %v4259_v35 = vld [vmem:[%s6419_s3 + $0xa] sm:$0x3] }
 0x2ad   :  { %v411_v38 = vmax.f32 %v401_v34, 0.0  ;;  %v1215_v34 = vsel %vm150_vm3, %v4253_v15, 0 }
 0x2ae   :  { %v410_v39 = vmax.f32 %v396_v37, 0.0  ;;  %4790 = vmatprep.subr.bf16.mxu0 %v486_v36 }
 0x2af   :  { %4791 = vmatpush3.bf16.msra.mxu0 %v486_v36 }
 0x2b0   :  { %v487_v40 = vpack.c.bf16 %v411_v38, %v410_v39 }
 0x2b2   :  { %4792 = vmatprep.subr.bf16.mxu0 %v487_v40 }
 0x2b3   :  { %4793 = vmatpush3.bf16.msra.mxu0 %v487_v40 }
 0x2b6   :  { %4795 = vmatmul.mubr.msk.bf16.vlgmr.msra.gmra.mrb[16].mxu0 %vm668_vm4, %v5283_v41 }
 0x2b7   :  { %4798 = vmatprep.mubr.msk.bf16.mxu0 %vm668_vm4, %v5284_v42 }
 0x2be   :  { %4799 = vmatmul.mubr.msk.bf16.gmra.mrb[20].mxu0 %vm668_vm4, %v5285_v43 }
 0x2bf   :  { %4802 = vmatprep.mubr.msk.bf16.mxu0 %vm668_vm4, %v5286_v44 }
 0x2c6   :  { %4803 = vmatmul.mubr.msk.bf16.gmra.mrb[24].mxu0 %vm668_vm4, %v5287_v45 }
 0x2c7   :  { %4806 = vmatprep.mubr.msk.bf16.mxu0 %vm668_vm4, %v5288_v46 }
 0x2ce   :  { %4807 = vmatmul.mubr.msk.bf16.gmra.mrb[28].mxu0 %vm668_vm4, %v5289_v47 }
 0x2cf   :  { %4810 = vmatprep.mubr.msk.bf16.mxu0 %vm668_vm4, %v5290_v48 }
 0x2d6   :  { %4811 = vmatmul.mubr.msk.bf16.gmra.mrb[32].mxu0 %vm668_vm4, %v5291_v49 }
 0x2d7   :  { %4814 = vmatprep.mubr.msk.bf16.mxu0 %vm668_vm4, %v5292_v50 }
 0x2de   :  { %4815 = vmatmul.mubr.msk.bf16.gmra.mrb[36].mxu0 %vm668_vm4, %v5293_v51 }
 0x2df   :  { %4818 = vmatprep.mubr.msk.bf16.mxu0 %vm668_vm4, %v5294_v52 }
 0x2e6   :  { %4819 = vmatmul.mubr.msk.bf16.gmra.mrb[40].mxu0 %vm668_vm4, %v5295_v53 }
 0x2e7   :  { %4822 = vmatprep.mubr.msk.bf16.mxu0 %vm668_vm4, %v5296_v54 }
 0x2ee   :  { %4823 = vmatmul.mubr.msk.bf16.gmra.mrb[44].mxu0 %vm668_vm4, %v5297_v55 }
 0x2ef   :  { %4826 = vmatprep.mubr.msk.bf16.mxu0 %vm668_vm4, %v5298_v56 }
 0x2f6   :  { %4827 = vmatmul.mubr.msk.bf16.gmra.mrb[48].mxu0 %vm668_vm4, %v5299_v57 }
 0x2f7   :  { %4830 = vmatprep.mubr.msk.bf16.mxu0 %vm668_vm4, %v5300_v58 }
 0x2fe   :  { %4831 = vmatmul.mubr.msk.bf16.gmra.mrb[52].mxu0 %vm668_vm4, %v5301_v59 }
 0x2ff   :  { %4834 = vmatprep.mubr.msk.bf16.mxu0 %vm668_vm4, %v5302_v60  ;;  %v1307_v60 = vsel %vm150_vm3, %v4259_v35, 0 }
 0x306   :  { %4835 = vmatmul.mubr.msk.bf16.gmra.mrb[56].mxu0 %vm668_vm4, %v5303_v61  ;;  %v4265_v61 = vld [vmem:[%s6419_s3 + $0xe] sm:$0x3] }
 0x307   :  { %4838 = vmatprep.mubr.msk.bf16.mxu0 %vm668_vm4, %v5304_v62 }
 0x30e   :  { %4839 = vmatmul.mubr.msk.bf16.gmra.mrb[60].mxu0 %vm668_vm4, %v5305_v63 }
 0x30f   :  { %4842 = vmatprep.mubr.msk.bf16.mxu0 %vm668_vm4, %v5306_v0 }
 0x316   :  { %4843 = vmatmul.mubr.msk.bf16.gmra.mrb[64].mxu0 %vm668_vm4, %v5307_v2 }
 0x317   :  { %4846 = vmatprep.mubr.msk.bf16.mxu0 %vm668_vm4, %v5308_v3 }
 0x31e   :  { %4847 = vmatmul.mubr.msk.bf16.gmra.mrb[68].mxu0 %vm668_vm4, %v5309_v4 }
 0x31f   :  { %4850 = vmatprep.mubr.msk.bf16.mxu0 %vm668_vm4, %v5310_v5 }
 0x326   :  { %4851 = vmatmul.mubr.msk.bf16.gmra.mrb[72].mxu0 %vm668_vm4, %v5311_v8 }
 0x327   :  { %4854 = vmatprep.mubr.msk.bf16.mxu0 %vm668_vm4, %v5312_v9 }
 0x32e   :  { %4855 = vmatmul.mubr.msk.bf16.gmra.mrb[76].mxu0 %vm668_vm4, %v5313_v10 }
 0x32f   :  { %4858 = vmatprep.mubr.msk.bf16.mxu0 %vm668_vm4, %v5314_v11 }
 0x336   :  { %4859 = vmatmul.mubr.msk.bf16.gmra.mrb[80].mxu0 %vm668_vm4, %v5315_v12 }
 0x337   :  { %4862 = vmatprep.mubr.msk.bf16.mxu0 %vm668_vm4, %v5316_v13 }
 0x33e   :  { %4863 = vmatmul.mubr.msk.bf16.gmra.mrb[84].mxu0 %vm668_vm4, %v5317_v14 }
 0x389   :  { %v5717_v16 = vpop.f32.mrb[16].mxu0 }
 0x38a   :  { %v5719_v17 = vpop.f32.mrb[17].mxu0 }
 0x38b   :  { %v5721_v18 = vpop.f32.mrb[18].mxu0 }
 0x38c   :  { %v1099_v19 = vpack.c.bf16 %v5721_v18, %v5717_v16  ;;  %v5725_v20 = vpop.f32.mrb[19].mxu0 }
 0x38d   :  { %v1098_v21 = vpack.c.bf16 %v5725_v20, %v5719_v17  ;;  %v4264_v17 = vld [vmem:[%s6419_s3 + $0xc] sm:$0x3] }
 0x38e   :  { %v1805_v18 = vsel %vm150_vm3, %v4264_v17, 0 }
 0x391   :  { %v5729_v22 = vpop.f32.mrb[20].mxu0 }
 0x392   :  { %v5731_v23 = vpop.f32.mrb[21].mxu0 }
 0x393   :  { %v5733_v24 = vpop.f32.mrb[22].mxu0 }
 0x394   :  { %v1101_v25 = vpack.c.bf16 %v5733_v24, %v5729_v22  ;;  %v5737_v26 = vpop.f32.mrb[23].mxu0 }
 0x395   :  { %v1100_v27 = vpack.c.bf16 %v5737_v26, %v5731_v23 }
 0x399   :  { %v4804_v28 = vpop.f32.mrb[24].mxu0 }
 0x39a   :  { %v843_v29 = vpop.f32.mrb[25].mxu0 }
 0x39b   :  { %v4805_v30 = vpop.f32.mrb[26].mxu0 }
 0x39c   :  { %v1104_v31 = vpack.c.bf16 %v4805_v30, %v4804_v28  ;;  %v846_v32 = vpop.f32.mrb[27].mxu0 }
 0x39d   :  { %v1103_v33 = vpack.c.bf16 %v846_v32, %v843_v29  ;;  %v1904_v29 = vld [vmem:[#allocation2 + $0x160] sm:$0xff] }
 0x39f   :  { %4868 = vmatprep.mubr.msk.bf16.mxu1 %vm1109_vm5, %v1103_v33  ;;  %v1906_v33 = vld [vmem:[#allocation2 + $0x170] sm:$0xff] }
 0x3a0   :  { %4869 = vmatmul.mubr.msk.bf16.vlgmr.msra.gmra.mrb[4].mxu1 %vm1109_vm5, %v1104_v31  ;;  %v6423_v31 = vmov 0  }
 0x3a1   :  { %v4808_v36 = vpop.f32.mrb[28].mxu0  ;;  %4877 = vmatpush3.bf16.msra.mxu1 %v1215_v34  ;;  %5280 = vset.pattern.permute.xlu0 %v6423_v31 }
 0x3a2   :  { %v859_v37 = vpop.f32.mrb[29].mxu0  ;;  %5266 = vmatprep.subr.msk.bf16.mxu1 %vm150_vm3, %v4259_v35  ;;  %5281 = vset.pattern.permute.xlu1 %v6423_v31  ;;  %v1905_v35 = vld [vmem:[#allocation2 + $0x168] sm:$0xff] }
 0x3a3   :  { %v4809_v38 = vpop.f32.mrb[30].mxu0  ;;  %1914 = vperm.xlu0 %5280, %v1904_v29   ;;  %1924 = vperm.xlu1 %5281, %v1906_v33  }
 0x3a4   :  { %v1106_v39 = vpack.c.bf16 %v4809_v38, %v4808_v36  ;;  %v862_v40 = vpop.f32.mrb[31].mxu0  ;;  %v1907_v38 = vld [vmem:[#allocation2 + $0x178] sm:$0xff] }
 0x3a5   :  { %v1105_v41 = vpack.c.bf16 %v862_v40, %v859_v37  ;;  %v1399_v40 = vsel %vm150_vm3, %v4265_v61, 0 }
 0x3a7   :  { %4872 = vmatprep.mubr.msk.bf16.mxu1 %vm1109_vm5, %v1105_v41  ;;  %1919 = vperm.xlu0 %5280, %v1905_v35   ;;  %v4270_v41 = vld [vmem:[%s6419_s3 + $0x10] sm:$0x3] }
 0x3a8   :  { %4873 = vmatmul.mubr.msk.bf16.gmra.mrb[8].mxu1 %vm1109_vm5, %v1106_v39  ;;  %1929 = vperm.xlu1 %5281, %v1907_v38  }
 0x3a9   :  { %v5750_v42 = vpop.f32.mrb[32].mxu0 }
 0x3aa   :  { %v5752_v43 = vpop.f32.mrb[33].mxu0 }
 0x3ab   :  { %v5754_v44 = vpop.f32.mrb[34].mxu0 }
 0x3ac   :  { %v1191_v45 = vpack.c.bf16 %v5754_v44, %v5750_v42  ;;  %v5758_v46 = vpop.f32.mrb[35].mxu0 }
 0x3ad   :  { %v1190_v47 = vpack.c.bf16 %v5758_v46, %v5752_v43 }
 0x3b1   :  { %v5762_v48 = vpop.f32.mrb[36].mxu0 }
 0x3b2   :  { %v5764_v49 = vpop.f32.mrb[37].mxu0 }
 0x3b3   :  { %v5766_v50 = vpop.f32.mrb[38].mxu0 }
 0x3b4   :  { %v1193_v51 = vpack.c.bf16 %v5766_v50, %v5762_v48  ;;  %v5770_v52 = vpop.f32.mrb[39].mxu0 }
 0x3b5   :  { %v1192_v53 = vpack.c.bf16 %v5770_v52, %v5764_v49 }
 0x3b9   :  { %v4820_v54 = vpop.f32.mrb[40].mxu0 }
 0x3ba   :  { %v907_v55 = vpop.f32.mrb[41].mxu0 }
 0x3bb   :  { %v4821_v56 = vpop.f32.mrb[42].mxu0 }
 0x3bc   :  { %v1197_v57 = vpack.c.bf16 %v4821_v56, %v4820_v54  ;;  %v910_v58 = vpop.f32.mrb[43].mxu0  ;;  %v1908_v54 = vld [vmem:[#allocation2 + $0x180] sm:$0xff] }
 0x3bd   :  { %v1196_v59 = vpack.c.bf16 %v910_v58, %v907_v55  ;;  %v1909_v55 = vld [vmem:[#allocation2 + $0x188] sm:$0xff]  ;;  %1934 = vperm.xlu0 %5280, %v1908_v54   ;;  %v4068_v54 = vld [vmem:[#allocation2 + $0x1d8] sm:$0x3f] }
 0x3be   :  { %1939 = vperm.xlu1 %5281, %v1909_v55  }
 0x3bf   :  { %4878 = vmatprep.mubr.msk.bf16.mxu1 %vm1109_vm5, %v1196_v59  ;;  %v1910_v59 = vld [vmem:[#allocation2 + $0x190] sm:$0xff] }
 0x3c0   :  { %4879 = vmatmul.mubr.msk.bf16.vlgmr.msra.gmra.mrb[4].mxu1 %vm1109_vm5, %v1197_v57 }
 0x3c1   :  { %v4824_v62 = vpop.f32.mrb[44].mxu0  ;;  %4887 = vmatpush3.bf16.msra.mxu1 %v1307_v60  ;;  %1944 = vperm.xlu0 %5280, %v1910_v59  }
 0x3c2   :  { %v923_v63 = vpop.f32.mrb[45].mxu0  ;;  %5267 = vmatprep.subr.msk.bf16.mxu1 %vm150_vm3, %v4265_v61 }
 0x3c3   :  { %v4825_v0 = vpop.f32.mrb[46].mxu0 }
 0x3c4   :  { %v1199_v2 = vpack.c.bf16 %v4825_v0, %v4824_v62  ;;  %v926_v3 = vpop.f32.mrb[47].mxu0  ;;  %v1911_v62 = vld [vmem:[#allocation2 + $0x198] sm:$0xff]  ;;  %v2939_v0 = vld [vmem:[#allocation2 + $0x1a0] sm:$0xff] }
 0x3c5   :  { %v1198_v4 = vpack.c.bf16 %v926_v3, %v923_v63  ;;  %1949 = vperm.xlu1 %5281, %v1911_v62   ;;  %2945 = vperm.xlu0 %5280, %v2939_v0   ;;  %v1485_v0 = vsel %vm150_vm3, %v4270_v41, 0 }
 0x3c7   :  { %4882 = vmatprep.mubr.msk.bf16.mxu1 %vm1109_vm5, %v1198_v4 }
 0x3c8   :  { %4883 = vmatmul.mubr.msk.bf16.gmra.mrb[8].mxu1 %vm1109_vm5, %v1199_v2  ;;  %v2940_v2 = vld [vmem:[#allocation2 + $0x1a8] sm:$0xff] }
 0x3c9   :  { %v5783_v5 = vpop.f32.mrb[48].mxu0  ;;  %2950 = vperm.xlu1 %5281, %v2940_v2   ;;  %v1102_v2 = vld [vmem:[%s6419_s3] sm:$0x3] }
 0x3ca   :  { %v5785_v6 = vpop.f32.mrb[49].mxu0 }
 0x3cb   :  { %v5787_v7 = vpop.f32.mrb[50].mxu0 }
 0x3cc   :  { %v1283_v8 = vpack.c.bf16 %v5787_v7, %v5783_v5  ;;  %v5791_v9 = vpop.f32.mrb[51].mxu0 }
 0x3cd   :  { %v1282_v10 = vpack.c.bf16 %v5791_v9, %v5785_v6 }
 0x3d1   :  { %v5795_v11 = vpop.f32.mrb[52].mxu0 }
 0x3d2   :  { %v5797_v12 = vpop.f32.mrb[53].mxu0 }
 0x3d3   :  { %v5799_v13 = vpop.f32.mrb[54].mxu0 }
 0x3d4   :  { %v1285_v14 = vpack.c.bf16 %v5799_v13, %v5795_v11  ;;  %v5803_v15 = vpop.f32.mrb[55].mxu0 }
 0x3d5   :  { %v1284_v28 = vpack.c.bf16 %v5803_v15, %v5797_v12 }
 0x3d9   :  { %v4836_v30 = vpop.f32.mrb[56].mxu0 }
 0x3da   :  { %v971_v32 = vpop.f32.mrb[57].mxu0 }
 0x3db   :  { %v4837_v34 = vpop.f32.mrb[58].mxu0 }
 0x3dc   :  { %v1289_v36 = vpack.c.bf16 %v4837_v34, %v4836_v30  ;;  %v974_v37 = vpop.f32.mrb[59].mxu0  ;;  %v2941_v30 = vld [vmem:[#allocation2 + $0x1b0] sm:$0xff]  ;;  %v2942_v34 = vld [vmem:[#allocation2 + $0x1b8] sm:$0xff] }
 0x3dd   :  { %v1288_v39 = vpack.c.bf16 %v974_v37, %v971_v32  ;;  %2955 = vperm.xlu0 %5280, %v2941_v30   ;;  %2960 = vperm.xlu1 %5281, %v2942_v34   ;;  %v4048_v37 = vld [vmem:[#allocation2 + $0x1c8] sm:$0xff] }
 0x3df   :  { %4888 = vmatprep.mubr.msk.bf16.mxu1 %vm1109_vm5, %v1288_v39 }
 0x3e0   :  { %4889 = vmatmul.mubr.msk.bf16.vlgmr.msra.gmra.mrb[4].mxu1 %vm1109_vm5, %v1289_v36  ;;  %v4047_v36 = vld [vmem:[#allocation2 + $0x1c0] sm:$0xff] }
 0x3e1   :  { %v4840_v56 = vpop.f32.mrb[60].mxu0  ;;  %4897 = vmatpush3.bf16.msra.mxu1 %v1399_v40  ;;  %4051 = vperm.xlu0 %5280, %v4047_v36  }
 0x3e2   :  { %v987_v57 = vpop.f32.mrb[61].mxu0  ;;  %5268 = vmatprep.subr.msk.bf16.mxu1 %vm150_vm3, %v4270_v41  ;;  %4056 = vperm.xlu1 %5281, %v4048_v37  }
 0x3e3   :  { %v4841_v58 = vpop.f32.mrb[62].mxu0 }
 0x3e4   :  { %v1291_v60 = vpack.c.bf16 %v4841_v58, %v4840_v56  ;;  %v990_v61 = vpop.f32.mrb[63].mxu0 }
 0x3e5   :  { %v1290_v63 = vpack.c.bf16 %v990_v61, %v987_v57  ;;  %4071 = vperm.xlu0 %5280, %v4068_v54  }
 0x3e7   :  { %4892 = vmatprep.mubr.msk.bf16.mxu1 %vm1109_vm5, %v1290_v63 }
 0x3e8   :  { %4893 = vmatmul.mubr.msk.bf16.gmra.mrb[8].mxu1 %vm1109_vm5, %v1291_v60 }
 0x3e9   :  { %v5818_v3 = vpop.f32.mrb[64].mxu0 }
 0x3ea   :  { %v5820_v4 = vpop.f32.mrb[65].mxu0 }
 0x3eb   :  { %v5822_v29 = vpop.f32.mrb[66].mxu0 }
 0x3ec   :  { %v1375_v32 = vpack.c.bf16 %v5822_v29, %v5818_v3  ;;  %v5826_v33 = vpop.f32.mrb[67].mxu0 }
 0x3ed   :  { %v1374_v35 = vpack.c.bf16 %v5826_v33, %v5820_v4  ;;  %v5319_v33 = vld [vmem:[%s6418_s2 + $0x128] sm:$0xff]  }
 0x3f1   :  { %v5830_v38 = vpop.f32.mrb[68].mxu0 }
 0x3f2   :  { %v5832_v39 = vpop.f32.mrb[69].mxu0 }
 0x3f3   :  { %v5834_v40 = vpop.f32.mrb[70].mxu0 }
 0x3f4   :  { %v1377_v55 = vpack.c.bf16 %v5834_v40, %v5830_v38  ;;  %v5838_v56 = vpop.f32.mrb[71].mxu0  ;;  %v5321_v38 = vld [vmem:[%s6418_s2 + $0x138] sm:$0xff]   ;;  %v5323_v40 = vld [vmem:[%s6418_s2 + $0x148] sm:$0xff]  }
 0x3f5   :  { %v1376_v57 = vpack.c.bf16 %v5838_v56, %v5832_v39  ;;  %v5322_v39 = vld [vmem:[%s6418_s2 + $0x140] sm:$0xff]   ;;  %v5325_v56 = vld [vmem:[%s6418_s2 + $0x158] sm:$0xff]  }
 0x3f9   :  { %v4852_v58 = vpop.f32.mrb[72].mxu0 }
 0x3fa   :  { %v1035_v59 = vpop.f32.mrb[73].mxu0 }
 0x3fb   :  { %v4853_v60 = vpop.f32.mrb[74].mxu0 }
 0x3fc   :  { %v1381_v61 = vpack.c.bf16 %v4853_v60, %v4852_v58  ;;  %v1038_v62 = vpop.f32.mrb[75].mxu0 }
 0x3fd   :  { %v1380_v63 = vpack.c.bf16 %v1038_v62, %v1035_v59 }
 0x3ff   :  { %4898 = vmatprep.mubr.msk.bf16.mxu1 %vm1109_vm5, %v1380_v63 }
 0x400   :  { %4899 = vmatmul.mubr.msk.bf16.vlgmr.msra.gmra.mrb[4].mxu1 %vm1109_vm5, %v1381_v61  ;;  %v1565_v61 = vsel %vm150_vm3, %v1102_v2, 0 }
 0x401   :  { %v4856_v30 = vpop.f32.mrb[76].mxu0  ;;  %4907 = vmatpush3.bf16.msra.mxu1 %v1485_v0  ;;  %v4252_v0 = vld [vmem:[%s6419_s3 + $0x4] sm:$0x3] }
 0x402   :  { %v1051_v34 = vpop.f32.mrb[77].mxu0  ;;  %5269 = vmatprep.subr.msk.bf16.mxu1 %vm150_vm3, %v1102_v2  ;;  %v4258_v2 = vld [vmem:[%s6419_s3 + $0x8] sm:$0x3] }
 0x403   :  { %v4857_v36 = vpop.f32.mrb[78].mxu0  ;;  %v1725_v16 = vsel %vm150_vm3, %v4258_v2, 0 }
 0x404   :  { %v1383_v37 = vpack.c.bf16 %v4857_v36, %v4856_v30  ;;  %v1054_v54 = vpop.f32.mrb[79].mxu0 }
 0x405   :  { %v1382_v58 = vpack.c.bf16 %v1054_v54, %v1051_v34 }
 0x407   :  { %4902 = vmatprep.mubr.msk.bf16.mxu1 %vm1109_vm5, %v1382_v58 }
 0x408   :  { %4903 = vmatmul.mubr.msk.bf16.gmra.mrb[8].mxu1 %vm1109_vm5, %v1383_v37 }
 0x409   :  { %v4860_v41 = vpop.f32.mrb[80].mxu0 }
 0x40a   :  { %v1067_v59 = vpop.f32.mrb[81].mxu0 }
 0x40b   :  { %v4861_v60 = vpop.f32.mrb[82].mxu0 }
 0x40c   :  { %v1467_v62 = vpack.c.bf16 %v4861_v60, %v4860_v41  ;;  %v1070_v63 = vpop.f32.mrb[83].mxu0  ;;  %v5327_v41 = vld [vmem:[%s6418_s2 + $0x168] sm:$0xff]   ;;  %v5329_v60 = vld [vmem:[%s6418_s2 + $0x178] sm:$0xff]  }
 0x40d   :  { %v1466_v31 = vpack.c.bf16 %v1070_v63, %v1067_v59  ;;  %v5328_v59 = vld [vmem:[%s6418_s2 + $0x170] sm:$0xff]   ;;  %v5331_v63 = vld [vmem:[%s6418_s2 + $0x188] sm:$0xff]  }
 0x40f   :  { %4908 = vmatprep.mubr.msk.bf16.mxu1 %vm1109_vm5, %v1466_v31  ;;  %v1645_v31 = vsel %vm150_vm3, %v4252_v0, 0 }
 0x410   :  { %4909 = vmatmul.mubr.msk.bf16.vlgmr.msra.gmra.mrb[4].mxu1 %vm1109_vm5, %v1467_v62  ;;  %v5330_v62 = vld [vmem:[%s6418_s2 + $0x180] sm:$0xff]  }
 0x411   :  { %v4864_v30 = vpop.f32.mrb[84].mxu0  ;;  %4917 = vmatpush3.bf16.msra.mxu1 %v1565_v61  ;;  %v5332_v61 = vld [vmem:[%s6418_s2 + $0x190] sm:$0xff]  }
 0x412   :  { %v1083_v34 = vpop.f32.mrb[85].mxu0  ;;  %5270 = vmatprep.subr.msk.bf16.mxu1 %vm150_vm3, %v4252_v0  ;;  %v5333_v0 = vld [vmem:[%s6418_s2 + $0x198] sm:$0xff]  }
 0x413   :  { %v4865_v36 = vpop.f32.mrb[86].mxu0 }
 0x414   :  { %v1469_v37 = vpack.c.bf16 %v4865_v36, %v4864_v30  ;;  %v1086_v54 = vpop.f32.mrb[87].mxu0  ;;  %v5334_v30 = vld [vmem:[%s6418_s2 + $0x1a0] sm:$0xff]   ;;  %v5336_v36 = vld [vmem:[%s6420_s4 + $0x8] sm:$0xff]  }
 0x415   :  { %v1468_v58 = vpack.c.bf16 %v1086_v54, %v1083_v34  ;;  %v5335_v34 = vld [vmem:[%s6418_s2 + $0x1a8] sm:$0xff]  }
 0x417   :  { %4912 = vmatprep.mubr.msk.bf16.mxu1 %vm1109_vm5, %v1468_v58 }
 0x418   :  { %4913 = vmatmul.mubr.msk.bf16.gmra.mrb[8].mxu1 %vm1109_vm5, %v1469_v37  ;;  %v5337_v37 = vld [vmem:[%s6420_s4 + $0x18] sm:$0xff]  }
 0x419   :  { %4918 = vmatprep.mubr.msk.bf16.mxu1 %vm1109_vm5, %v1098_v21 }
 0x420   :  { %4919 = vmatmul.mubr.msk.bf16.vlgmr.msra.gmra.mrb[4].mxu1 %vm1109_vm5, %v1099_v19  ;;  %v5318_v19 = vld [vmem:[%s6418_s2 + $0x120] sm:$0xff]  }
 0x421   :  { %4922 = vmatprep.mubr.msk.bf16.mxu1 %vm1109_vm5, %v1100_v27  ;;  %4927 = vmatpush3.bf16.msra.mxu1 %v1645_v31 }
 0x422   :  { %5271 = vmatprep.subr.msk.bf16.mxu1 %vm150_vm3, %v4258_v2  ;;  %4964 = vmatprep.mubr.msk.bf16.mxu0 %vm668_vm4, %v5318_v19  ;;  %v1915_v20 = vpop.permute.xlu0 %1914  ;;  %v1925_v21 = vpop.permute.xlu1 %1924 }
 0x426   :  { %v1920_v22 = vpop.permute.xlu0 %1919 }
 0x427   :  { %v1930_v23 = vpop.permute.xlu1 %1929 }
 0x428   :  { %4923 = vmatmul.mubr.msk.bf16.gmra.mrb[8].mxu1 %vm1109_vm5, %v1101_v25 }
 0x429   :  { %4928 = vmatprep.mubr.msk.bf16.mxu1 %vm1109_vm5, %v1190_v47 }
 0x430   :  { %4929 = vmatmul.mubr.msk.bf16.vlgmr.msra.gmra.mrb[4].mxu1 %vm1109_vm5, %v1191_v45 }
 0x431   :  { %4932 = vmatprep.mubr.msk.bf16.mxu1 %vm1109_vm5, %v1192_v53  ;;  %4937 = vmatpush3.bf16.msra.mxu1 %v1725_v16 }
 0x432   :  { %5272 = vmatprep.subr.msk.bf16.mxu1 %vm150_vm3, %v4264_v17 }
 0x438   :  { %4933 = vmatmul.mubr.msk.bf16.gmra.mrb[8].mxu1 %vm1109_vm5, %v1193_v51 }
 0x439   :  { %4938 = vmatprep.mubr.msk.bf16.mxu1 %vm1109_vm5, %v1282_v10 }
 0x43c   :  { %v1935_v27 = vpop.permute.xlu0 %1934 }
 0x43d   :  { %v1940_v47 = vpop.permute.xlu1 %1939 }
 0x440   :  { %4939 = vmatmul.mubr.msk.bf16.vlgmr.msra.gmra.mrb[4].mxu1 %vm1109_vm5, %v1283_v8  ;;  %v1945_v53 = vpop.permute.xlu0 %1944 }
 0x441   :  { %4942 = vmatprep.mubr.msk.bf16.mxu1 %vm1109_vm5, %v1284_v28  ;;  %4947 = vmatpush3.bf16.msra.mxu1 %v1805_v18 }
 0x442   :  { %5000 = vmatprep.subr.bf16.mxu1 %v5336_v36 }
 0x444   :  { %v1950_v10 = vpop.permute.xlu1 %1949 }
 0x448   :  { %4943 = vmatmul.mubr.msk.bf16.gmra.mrb[8].mxu1 %vm1109_vm5, %v1285_v14 }
 0x449   :  { %4948 = vmatprep.mubr.msk.bf16.mxu1 %vm1109_vm5, %v1374_v35  ;;  %v5320_v35 = vld [vmem:[%s6418_s2 + $0x130] sm:$0xff]  }
 0x450   :  { %4949 = vmatmul.mubr.msk.bf16.vlgmr.msra.gmra.mrb[4].mxu1 %vm1109_vm5, %v1375_v32 }
 0x451   :  { %4952 = vmatprep.mubr.msk.bf16.mxu1 %vm1109_vm5, %v1376_v57  ;;  %v5326_v57 = vld [vmem:[%s6418_s2 + $0x160] sm:$0xff]   ;;  %5001 = vmatpush3.bf16.msra.mxu1 %v5336_v36  ;;  %v6425_v36 = vmov 0  }
 0x452   :  { %5006 = vmatprep.subr.bf16.mxu1 %v5337_v37 }
 0x458   :  { %4953 = vmatmul.mubr.msk.bf16.gmra.mrb[8].mxu1 %vm1109_vm5, %v1377_v55  ;;  %v5324_v55 = vld [vmem:[%s6418_s2 + $0x150] sm:$0xff]  }
 0x523   :  { %v4950_v24 = vpop.f32.mrb[4].mxu1 }
 0x524   :  { %v1954_v25 = vadd.f32 %v4950_v24, %v1925_v21  ;;  %v1841_v26 = vpop.f32.mrb[5].mxu1  ;;  %v5338_v24 = vld [vmem:[%s6420_s4 + $0x28] sm:$0xff]  }
 0x525   :  { %v1952_v42 = vadd.f32 %v1915_v20, %v1841_v26  ;;  %v4951_v43 = vpop.f32.mrb[6].mxu1 }
 0x526   :  { %v1955_v44 = vadd.f32 %v4951_v43, %v1930_v23  ;;  %v1844_v45 = vpop.f32.mrb[7].mxu1  ;;  %v1962_v48 = vmax.f32 %v1954_v25, 0.0 }
 0x527   :  { %v1953_v46 = vadd.f32 %v1920_v22, %v1844_v45  ;;  %v1960_v50 = vmax.f32 %v1952_v42, 0.0 }
 0x528   :  { %v1963_v49 = vmax.f32 %v1955_v44, 0.0 }
 0x529   :  { %v1961_v51 = vmax.f32 %v1953_v46, 0.0 }
 0x52a   :  { %v2005_v52 = vpack.c.bf16 %v1963_v49, %v1962_v48 }
 0x52b   :  { %v2004_v5 = vpack.c.bf16 %v1961_v51, %v1960_v50  ;;  %v4954_v6 = vpop.f32.mrb[8].mxu1  ;;  %v5339_v51 = vld [vmem:[%s6420_s4 + $0x38] sm:$0xff]  }
 0x52c   :  { %v1958_v7 = vadd.f32 %v4954_v6, %v1945_v53  ;;  %v1857_v8 = vpop.f32.mrb[9].mxu1 }
 0x52d   :  { %v1956_v9 = vadd.f32 %v1935_v27, %v1857_v8  ;;  %v4955_v11 = vpop.f32.mrb[10].mxu1  ;;  %4956 = vmatprep.subr.bf16.mxu0 %v2004_v5 }
 0x52e   :  { %v1959_v12 = vadd.f32 %v4955_v11, %v1950_v10  ;;  %v1860_v13 = vpop.f32.mrb[11].mxu1  ;;  %4957 = vmatpush3.bf16.msra.mxu0 %v2004_v5  ;;  %v1966_v15 = vmax.f32 %v1958_v7, 0.0 }
 0x52f   :  { %v1957_v14 = vadd.f32 %v1940_v47, %v1860_v13  ;;  %4958 = vmatprep.subr.bf16.mxu0 %v2005_v52  ;;  %v1964_v3 = vmax.f32 %v1956_v9, 0.0 }
 0x530   :  { %v1967_v28 = vmax.f32 %v1959_v12, 0.0 }
 0x531   :  { %v1965_v4 = vmax.f32 %v1957_v14, 0.0 }
 0x532   :  { %v2007_v29 = vpack.c.bf16 %v1967_v28, %v1966_v15  ;;  %4959 = vmatpush3.bf16.msra.mxu0 %v2005_v52  ;;  %v5340_v15 = vld [vmem:[%s6420_s4 + $0x40] sm:$0xff]  }
 0x533   :  { %v2006_v32 = vpack.c.bf16 %v1965_v4, %v1964_v3 }
 0x535   :  { %4960 = vmatprep.subr.bf16.mxu0 %v2006_v32 }
 0x536   :  { %4961 = vmatpush3.bf16.msra.mxu0 %v2006_v32 }
 0x537   :  { %4962 = vmatprep.subr.bf16.mxu0 %v2007_v29 }
 0x53a   :  { %4963 = vmatpush3.bf16.msra.mxu0 %v2007_v29 }
 0x53b   :  { %5054 = vmatprep.subr.bf16.mxu0 %v5499_v1 }
 0x53d   :  { %4965 = vmatmul.mubr.msk.bf16.vlgmr.msra.gmra.mrb[88].mxu0 %vm668_vm4, %v5319_v33 }
 0x53e   :  { %4968 = vmatprep.mubr.msk.bf16.mxu0 %vm668_vm4, %v5320_v35 }
 0x545   :  { %4969 = vmatmul.mubr.msk.bf16.gmra.mrb[92].mxu0 %vm668_vm4, %v5321_v38 }
 0x546   :  { %4972 = vmatprep.mubr.msk.bf16.mxu0 %vm668_vm4, %v5322_v39 }
 0x54d   :  { %4973 = vmatmul.mubr.msk.bf16.gmra.mrb[96].mxu0 %vm668_vm4, %v5323_v40 }
 0x54e   :  { %4976 = vmatprep.mubr.msk.bf16.mxu0 %vm668_vm4, %v5324_v55 }
 0x555   :  { %4977 = vmatmul.mubr.msk.bf16.gmra.mrb[100].mxu0 %vm668_vm4, %v5325_v56 }
 0x556   :  { %4980 = vmatprep.mubr.msk.bf16.mxu0 %vm668_vm4, %v5326_v57  ;;  %v5341_v57 = vld [vmem:[%s6420_s4] sm:$0xff]  }
 0x55d   :  { %4981 = vmatmul.mubr.msk.bf16.gmra.mrb[104].mxu0 %vm668_vm4, %v5327_v41 }
 0x55e   :  { %4984 = vmatprep.mubr.msk.bf16.mxu0 %vm668_vm4, %v5328_v59 }
 0x565   :  { %4985 = vmatmul.mubr.msk.bf16.gmra.mrb[108].mxu0 %vm668_vm4, %v5329_v60 }
 0x566   :  { %4988 = vmatprep.mubr.msk.bf16.mxu0 %vm668_vm4, %v5330_v62 }
 0x56d   :  { %4989 = vmatmul.mubr.msk.bf16.gmra.mrb[112].mxu0 %vm668_vm4, %v5331_v63 }
 0x56e   :  { %4992 = vmatprep.mubr.msk.bf16.mxu0 %vm668_vm4, %v5332_v61 }
 0x575   :  { %4993 = vmatmul.mubr.msk.bf16.gmra.mrb[116].mxu0 %vm668_vm4, %v5333_v0  ;;  %v5342_v0 = vld [vmem:[%s6420_s4 + $0x10] sm:$0xff]  }
 0x576   :  { %4996 = vmatprep.mubr.msk.bf16.mxu0 %vm668_vm4, %v5334_v30  ;;  %v5343_v30 = vld [vmem:[%s6420_s4 + $0x20] sm:$0xff]  }
 0x57d   :  { %4997 = vmatmul.mubr.msk.bf16.gmra.mrb[120].mxu0 %vm668_vm4, %v5335_v34  ;;  %v5344_v34 = vld [vmem:[%s6420_s4 + $0x30] sm:$0xff]  }
 0x57e   :  { %5058 = vmatprep.mubr.msk.bf16.mxu0 %vm5498_vm0, %v5499_v1 }
 0x610   :  { %v6016_v54 = vpop.f32.mrb[88].mxu0 }
 0x611   :  { %v6018_v58 = vpop.f32.mrb[89].mxu0 }
 0x612   :  { %v6020_v31 = vpop.f32.mrb[90].mxu0 }
 0x613   :  { %v2330_v2 = vpack.c.bf16 %v6020_v31, %v6016_v54  ;;  %v6024_v16 = vpop.f32.mrb[91].mxu0  ;;  %v2951_v54 = vpop.permute.xlu1 %2950 }
 0x614   :  { %v2329_v17 = vpack.c.bf16 %v6024_v16, %v6018_v58 }
 0x618   :  { %v4970_v18 = vpop.f32.mrb[92].mxu0 }
 0x619   :  { %v2202_v19 = vpop.f32.mrb[93].mxu0 }
 0x61a   :  { %v4971_v20 = vpop.f32.mrb[94].mxu0 }
 0x61b   :  { %v2334_v21 = vpack.c.bf16 %v4971_v20, %v4970_v18  ;;  %v2205_v22 = vpop.f32.mrb[95].mxu0 }
 0x61c   :  { %v2333_v23 = vpack.c.bf16 %v2205_v22, %v2202_v19 }
 0x61e   :  { %5002 = vmatprep.mubr.msk.bf16.mxu1 %vm2344_vm6, %v2333_v23 }
 0x61f   :  { %5003 = vmatmul.mubr.msk.bf16.vlgmr.msra.gmra.mrb[12].mxu1 %vm2344_vm6, %v2334_v21 }
 0x620   :  { %v6033_v25 = vpop.f32.mrb[96].mxu0  ;;  %5007 = vmatpush3.bf16.msra.mxu1 %v5337_v37  ;;  %v2946_v37 = vpop.permute.xlu0 %2945 }
 0x621   :  { %v6035_v26 = vpop.f32.mrb[97].mxu0  ;;  %5012 = vmatprep.subr.bf16.mxu1 %v5338_v24 }
 0x622   :  { %v6037_v27 = vpop.f32.mrb[98].mxu0 }
 0x623   :  { %v2401_v42 = vpack.c.bf16 %v6037_v27, %v6033_v25  ;;  %v2221_v43 = vpop.f32.mrb[99].mxu0 }
 0x624   :  { %v2400_v44 = vpack.c.bf16 %v2221_v43, %v6035_v26  ;;  %v2956_v58 = vpop.permute.xlu0 %2955  ;;  %v5345_v43 = vld [vmem:[%s6418_s2 + $0x1b0] sm:$0xff]  }
 0x628   :  { %v4978_v45 = vpop.f32.mrb[100].mxu0 }
 0x629   :  { %v2234_v46 = vpop.f32.mrb[101].mxu0 }
 0x62a   :  { %v4979_v47 = vpop.f32.mrb[102].mxu0 }
 0x62b   :  { %v2406_v48 = vpack.c.bf16 %v4979_v47, %v4978_v45  ;;  %v2237_v49 = vpop.f32.mrb[103].mxu0  ;;  %v5347_v45 = vld [vmem:[%s6418_s2 + $0x1c0] sm:$0xff]   ;;  %v5349_v47 = vld [vmem:[%s6418_s2 + $0x1d0] sm:$0xff]  }
 0x62c   :  { %v2405_v50 = vpack.c.bf16 %v2237_v49, %v2234_v46  ;;  %v5348_v46 = vld [vmem:[%s6418_s2 + $0x1c8] sm:$0xff]   ;;  %v5351_v49 = vld [vmem:[%s6418_s2 + $0x1e0] sm:$0xff]  }
 0x62e   :  { %5008 = vmatprep.mubr.msk.bf16.mxu1 %vm2344_vm6, %v2405_v50  ;;  %v5352_v50 = vld [vmem:[%s6418_s2 + $0x1e8] sm:$0xff]  }
 0x62f   :  { %5009 = vmatmul.mubr.msk.bf16.vlgmr.msra.gmra.mrb[12].mxu1 %vm2344_vm6, %v2406_v48  ;;  %v5350_v48 = vld [vmem:[%s6418_s2 + $0x1d8] sm:$0xff]  }
 0x630   :  { %v4982_v52 = vpop.f32.mrb[104].mxu0  ;;  %5013 = vmatpush3.bf16.msra.mxu1 %v5338_v24 }
 0x631   :  { %v2250_v53 = vpop.f32.mrb[105].mxu0  ;;  %5018 = vmatprep.subr.bf16.mxu1 %v5339_v51 }
 0x632   :  { %v4983_v5 = vpop.f32.mrb[106].mxu0 }
 0x633   :  { %v2472_v6 = vpack.c.bf16 %v4983_v5, %v4982_v52  ;;  %v2253_v7 = vpop.f32.mrb[107].mxu0  ;;  %v5434_v52 = vld [vmem:[%s6421_s5 + $0x44] ss:$8 sps:$4 sm:$0xff]   ;;  %v5354_v5 = vld [vmem:[%s6421_s5 + $0xc0] ss:$8 sps:$4 sm:$0xff]  }
 0x634   :  { %v2471_v8 = vpack.c.bf16 %v2253_v7, %v2250_v53  ;;  %v5432_v53 = vld [vmem:[%s6421_s5 + $0x40] ss:$8 sps:$4 sm:$0xff]   ;;  %v5440_v7 = vld [vmem:[%s6421_s5 + $0x54] ss:$8 sps:$4 sm:$0xff]  }
 0x638   :  { %v4986_v9 = vpop.f32.mrb[108].mxu0 }
 0x639   :  { %v2266_v10 = vpop.f32.mrb[109].mxu0 }
 0x63a   :  { %v4987_v11 = vpop.f32.mrb[110].mxu0 }
 0x63b   :  { %v2477_v12 = vpack.c.bf16 %v4987_v11, %v4986_v9  ;;  %v2269_v13 = vpop.f32.mrb[111].mxu0  ;;  %v5446_v9 = vld [vmem:[%s6421_s5 + $0x64] ss:$8 sps:$4 sm:$0xff]   ;;  %v5357_v11 = vld [vmem:[%s6421_s5 + $0xd0] ss:$8 sps:$4 sm:$0xff]  }
 0x63c   :  { %v2476_v14 = vpack.c.bf16 %v2269_v13, %v2266_v10  ;;  %v5444_v10 = vld [vmem:[%s6421_s5 + $0x60] ss:$8 sps:$4 sm:$0xff]   ;;  %v5452_v13 = vld [vmem:[%s6421_s5 + $0x74] ss:$8 sps:$4 sm:$0xff]  }
 0x63e   :  { %5014 = vmatprep.mubr.msk.bf16.mxu1 %vm2344_vm6, %v2476_v14  ;;  %v5450_v14 = vld [vmem:[%s6421_s5 + $0x70] ss:$8 sps:$4 sm:$0xff]  }
 0x63f   :  { %5015 = vmatmul.mubr.msk.bf16.vlgmr.msra.gmra.mrb[12].mxu1 %vm2344_vm6, %v2477_v12  ;;  %v5359_v12 = vld [vmem:[%s6421_s5 + $0xd4] ss:$8 sps:$4 sm:$0xff]  }
 0x640   :  { %v4990_v28 = vpop.f32.mrb[112].mxu0  ;;  %5019 = vmatpush3.bf16.msra.mxu1 %v5339_v51  ;;  %v5353_v51 = vld [vmem:[%s6418_s2 + $0x1f0] sm:$0xff]  }
 0x641   :  { %v2282_v3 = vpop.f32.mrb[113].mxu0  ;;  %5024 = vmatprep.subr.bf16.mxu1 %v5340_v15 }
 0x642   :  { %v4991_v4 = vpop.f32.mrb[114].mxu0 }
 0x643   :  { %v2543_v29 = vpack.c.bf16 %v4991_v4, %v4990_v28  ;;  %v2285_v32 = vpop.f32.mrb[115].mxu0  ;;  %v5362_v28 = vld [vmem:[%s6421_s5 + $0xe4] ss:$8 sps:$4 sm:$0xff]   ;;  %v5363_v4 = vld [vmem:[%s6421_s5 + $0xf0] ss:$8 sps:$4 sm:$0xff]  }
 0x644   :  { %v2542_v33 = vpack.c.bf16 %v2285_v32, %v2282_v3  ;;  %v5365_v3 = vld [vmem:[%s6421_s5 + $0xf4] ss:$8 sps:$4 sm:$0xff]  }
 0x648   :  { %v4994_v35 = vpop.f32.mrb[116].mxu0 }
 0x649   :  { %v2298_v38 = vpop.f32.mrb[117].mxu0 }
 0x64a   :  { %v4995_v39 = vpop.f32.mrb[118].mxu0 }
 0x64b   :  { %v2548_v40 = vpack.c.bf16 %v4995_v39, %v4994_v35  ;;  %v2301_v55 = vpop.f32.mrb[119].mxu0 }
 0x64c   :  { %v2547_v56 = vpack.c.bf16 %v2301_v55, %v2298_v38 }
 0x64e   :  { %5020 = vmatprep.mubr.msk.bf16.mxu1 %vm2344_vm6, %v2547_v56 }
 0x64f   :  { %5021 = vmatmul.mubr.msk.bf16.vlgmr.msra.gmra.mrb[12].mxu1 %vm2344_vm6, %v2548_v40 }
 0x650   :  { %v4998_v41 = vpop.f32.mrb[120].mxu0  ;;  %5025 = vmatpush3.bf16.msra.mxu1 %v5340_v15  ;;  %v5360_v15 = vld [vmem:[%s6421_s5 + $0xe0] ss:$8 sps:$4 sm:$0xff]  }
 0x651   :  { %v2314_v59 = vpop.f32.mrb[121].mxu0  ;;  %5030 = vmatprep.subr.bf16.mxu1 %v5341_v57 }
 0x652   :  { %v4999_v60 = vpop.f32.mrb[122].mxu0 }
 0x653   :  { %v2614_v62 = vpack.c.bf16 %v4999_v60, %v4998_v41  ;;  %v2317_v63 = vpop.f32.mrb[123].mxu0 }
 0x654   :  { %v2613_v61 = vpack.c.bf16 %v2317_v63, %v2314_v59 }
 0x656   :  { %5026 = vmatprep.mubr.msk.bf16.mxu1 %vm2344_vm6, %v2613_v61 }
 0x65b   :  { %5027 = vmatmul.mubr.msk.bf16.vlgmr.msra.gmra.mrb[12].mxu1 %vm2344_vm6, %v2614_v62 }
 0x65c   :  { %5032 = vmatprep.mubr.msk.bf16.mxu1 %vm2344_vm6, %v2329_v17  ;;  %5031 = vmatpush3.bf16.msra.mxu1 %v5341_v57  ;;  %v2961_v17 = vpop.permute.xlu1 %2960 }
 0x65d   :  { %5036 = vmatprep.subr.bf16.mxu1 %v5342_v0 }
 0x667   :  { %5033 = vmatmul.mubr.msk.bf16.vlgmr.msra.gmra.mrb[12].mxu1 %vm2344_vm6, %v2330_v2 }
 0x668   :  { %5038 = vmatprep.mubr.msk.bf16.mxu1 %vm2344_vm6, %v2400_v44  ;;  %5037 = vmatpush3.bf16.msra.mxu1 %v5342_v0  ;;  %v5346_v44 = vld [vmem:[%s6418_s2 + $0x1b8] sm:$0xff]  }
 0x669   :  { %5042 = vmatprep.subr.bf16.mxu1 %v5343_v30 }
 0x673   :  { %5039 = vmatmul.mubr.msk.bf16.vlgmr.msra.gmra.mrb[12].mxu1 %vm2344_vm6, %v2401_v42 }
 0x674   :  { %5044 = vmatprep.mubr.msk.bf16.mxu1 %vm2344_vm6, %v2471_v8  ;;  %5043 = vmatpush3.bf16.msra.mxu1 %v5343_v30  ;;  %v5438_v8 = vld [vmem:[%s6421_s5 + $0x50] ss:$8 sps:$4 sm:$0xff]  }
 0x675   :  { %5048 = vmatprep.subr.bf16.mxu1 %v5344_v34 }
 0x67f   :  { %5045 = vmatmul.mubr.msk.bf16.vlgmr.msra.gmra.mrb[12].mxu1 %vm2344_vm6, %v2472_v6  ;;  %v5356_v6 = vld [vmem:[%s6421_s5 + $0xc4] ss:$8 sps:$4 sm:$0xff]  }
 0x680   :  { %5050 = vmatprep.mubr.msk.bf16.mxu1 %vm2344_vm6, %v2542_v33  ;;  %5049 = vmatpush3.bf16.msra.mxu1 %v5344_v34 }
 0x681   :  { %3336 = vmatprep.subr.bf16.mxu1 %v5356_v6  ;;  %v5387_v6 = vld [vmem:[%s6421_s5 + $0x1f0] ss:$8 sps:$4 sm:$0xff]  }
 0x68b   :  { %5051 = vmatmul.mubr.msk.bf16.vlgmr.msra.gmra.mrb[12].mxu1 %vm2344_vm6, %v2543_v29  ;;  %v5368_v29 = vld [vmem:[%s6421_s5 + $0x144] ss:$8 sps:$4 sm:$0xff]  }
 0x68c   :  { %3368 = vmatprep.mubr.bf16.mxu1 %v6425_v36  ;;  %3337 = vmatpush1.bf16.msra.mxu1 %v5354_v5  ;;  %v5389_v5 = vld [vmem:[%s6421_s5 + $0x1f4] ss:$8 sps:$4 sm:$0xff]  }
 0x68d   :  { %3338 = vmatprep.subr.bf16.mxu1 %v5359_v12 }
 0x690   :  { %3339 = vmatpush1.bf16.msra.mxu1 %v5357_v11  ;;  %v5390_v11 = vld [vmem:[%s6421_s5 + $0x200] ss:$8 sps:$4 sm:$0xff]  }
 0x691   :  { %3340 = vmatprep.subr.bf16.mxu1 %v5362_v28  ;;  %v5398_v28 = vld [vmem:[%s6421_s5 + $0x224] ss:$8 sps:$4 sm:$0xff]  }
 0x694   :  { %3341 = vmatpush1.bf16.msra.mxu1 %v5360_v15  ;;  %v5393_v15 = vld [vmem:[%s6421_s5 + $0x210] ss:$8 sps:$4 sm:$0xff]  }
 0x695   :  { %3342 = vmatprep.subr.bf16.mxu1 %v5365_v3 }
 0x698   :  { %3343 = vmatpush1.bf16.msra.mxu1 %v5363_v4 }
 0x699   :  { %3442 = vmatprep.subr.bf16.mxu1 %v5368_v29  ;;  %v5396_v29 = vld [vmem:[%s6421_s5 + $0x220] ss:$8 sps:$4 sm:$0xff]  }
 0x75e   :  { %v5052_v31 = vpop.f32.mrb[12].mxu1 }
 0x75f   :  { %v2965_v2 = vadd.f32 %v5052_v31, %v2956_v58  ;;  %v2908_v16 = vpop.f32.mrb[13].mxu1  ;;  %v5369_v31 = vld [vmem:[%s6421_s5 + $0x150] ss:$8 sps:$4 sm:$0xff]  }
 0x760   :  { %v2963_v18 = vadd.f32 %v2946_v37, %v2908_v16  ;;  %v5053_v19 = vpop.f32.mrb[14].mxu1  ;;  %v5366_v37 = vld [vmem:[%s6421_s5 + $0x140] ss:$8 sps:$4 sm:$0xff]  }
 0x761   :  { %v2966_v20 = vadd.f32 %v5053_v19, %v2961_v17  ;;  %v2911_v21 = vpop.f32.mrb[15].mxu1  ;;  %v2969_v23 = vmax.f32 %v2965_v2, 0.0  ;;  %v5374_v2 = vld [vmem:[%s6421_s5 + $0x164] ss:$8 sps:$4 sm:$0xff]  }
 0x762   :  { %v2964_v22 = vadd.f32 %v2951_v54, %v2911_v21  ;;  %v2967_v25 = vmax.f32 %v2963_v18, 0.0  ;;  %v5372_v18 = vld [vmem:[%s6421_s5 + $0x160] ss:$8 sps:$4 sm:$0xff]  }
 0x763   :  { %v2970_v24 = vmax.f32 %v2966_v20, 0.0 }
 0x764   :  { %v2968_v26 = vmax.f32 %v2964_v22, 0.0  ;;  %v5377_v22 = vld [vmem:[%s6421_s5 + $0x174] ss:$8 sps:$4 sm:$0xff]  }
 0x765   :  { %v2990_v27 = vpack.c.bf16 %v2970_v24, %v2969_v23  ;;  %v5375_v23 = vld [vmem:[%s6421_s5 + $0x170] ss:$8 sps:$4 sm:$0xff]   ;;  %v5380_v24 = vld [vmem:[%s6421_s5 + $0x1c4] ss:$8 sps:$4 sm:$0xff]  }
 0x766   :  { %v2989_v42 = vpack.c.bf16 %v2968_v26, %v2967_v25 }
 0x768   :  { %5055 = vmatpush3.bf16.msra.mxu0 %v2989_v42  ;;  %v5378_v42 = vld [vmem:[%s6421_s5 + $0x1c0] ss:$8 sps:$4 sm:$0xff]  }
 0x769   :  { %5056 = vmatprep.subr.bf16.mxu0 %v5499_v1 }
 0x76c   :  { %5057 = vmatpush3.bf16.msra.mxu0 %v2990_v27 }
 0x76d   :  { %3230 = vmatprep.subr.bf16.mxu0 %v5434_v52 }
 0x76f   :  { %5059 = vmatmul.mubr.msk.bf16.vlgmr.msra.gmra.mrb[124].mxu0 %vm43_vm1, %v5345_v43 }
 0x770   :  { %5062 = vmatprep.mubr.msk.bf16.mxu0 %vm5498_vm0, %v5499_v1  ;;  %3231 = vmatpush1.bf16.msra.mxu0 %v5432_v53 }
 0x771   :  { %3232 = vmatprep.subr.bf16.mxu0 %v5440_v7  ;;  %v5392_v7 = vld [vmem:[%s6421_s5 + $0x204] ss:$8 sps:$4 sm:$0xff]  }
 0x774   :  { %3233 = vmatpush1.bf16.msra.mxu0 %v5438_v8 }
 0x775   :  { %3234 = vmatprep.subr.bf16.mxu0 %v5446_v9 }
 0x777   :  { %5063 = vmatmul.mubr.msk.bf16.gmra.mrb[128].mxu0 %vm43_vm1, %v5346_v44  ;;  %v5383_v44 = vld [vmem:[%s6421_s5 + $0x1d4] ss:$8 sps:$4 sm:$0xff]  }
 0x778   :  { %5066 = vmatprep.mubr.msk.bf16.mxu0 %vm5498_vm0, %v5499_v1  ;;  %3235 = vmatpush1.bf16.msra.mxu0 %v5444_v10 }
 0x779   :  { %3236 = vmatprep.subr.bf16.mxu0 %v5452_v13  ;;  %v5395_v13 = vld [vmem:[%s6421_s5 + $0x214] ss:$8 sps:$4 sm:$0xff]  }
 0x77c   :  { %3237 = vmatpush1.bf16.msra.mxu0 %v5450_v14 }
 0x77f   :  { %5067 = vmatmul.mubr.msk.bf16.gmra.mrb[132].mxu0 %vm43_vm1, %v5347_v45 }
 0x780   :  { %5070 = vmatprep.mubr.msk.bf16.mxu0 %vm5498_vm0, %v5499_v1 }
 0x787   :  { %5071 = vmatmul.mubr.msk.bf16.gmra.mrb[136].mxu0 %vm43_vm1, %v5348_v46  ;;  %v5381_v46 = vld [vmem:[%s6421_s5 + $0x1d0] ss:$8 sps:$4 sm:$0xff]  }
 0x788   :  { %5074 = vmatprep.mubr.msk.bf16.mxu0 %vm5498_vm0, %v5499_v1 }
 0x78f   :  { %5075 = vmatmul.mubr.msk.bf16.gmra.mrb[140].mxu0 %vm43_vm1, %v5349_v47  ;;  %v5386_v47 = vld [vmem:[%s6421_s5 + $0x1e4] ss:$8 sps:$4 sm:$0xff]  }
 0x790   :  { %5078 = vmatprep.mubr.msk.bf16.mxu0 %vm5498_vm0, %v5499_v1 }
 0x797   :  { %5079 = vmatmul.mubr.msk.bf16.gmra.mrb[144].mxu0 %vm43_vm1, %v5350_v48 }
 0x798   :  { %5082 = vmatprep.mubr.msk.bf16.mxu0 %vm5498_vm0, %v5499_v1 }
 0x79f   :  { %5083 = vmatmul.mubr.msk.bf16.gmra.mrb[148].mxu0 %vm43_vm1, %v5351_v49 }
 0x7a0   :  { %5086 = vmatprep.mubr.msk.bf16.mxu0 %vm5498_vm0, %v5499_v1 }
 0x7a7   :  { %5087 = vmatmul.mubr.msk.bf16.gmra.mrb[152].mxu0 %vm43_vm1, %v5352_v50  ;;  %v5384_v50 = vld [vmem:[%s6421_s5 + $0x1e0] ss:$8 sps:$4 sm:$0xff]  }
 0x7a8   :  { %5090 = vmatprep.mubr.msk.bf16.mxu0 %vm5498_vm0, %v5499_v1 }
 0x7af   :  { %5091 = vmatmul.mubr.msk.bf16.gmra.mrb[156].mxu0 %vm43_vm1, %v5353_v51 }
 0x7b0   :  { %3262 = vmatprep.mubr.bf16.mxu0 %v6425_v36 }
 0x842   :  { %v6191_v32 = vpop.f32.mrb[124].mxu0 }
 0x843   :  { %v5060_v33 = vpop.f32.mrb[125].mxu0 }
 0x844   :  { %v6193_v35 = vpop.f32.mrb[126].mxu0 }
 0x845   :  { %v3168_v38 = vpack.c.bf16 %v6193_v35, %v6191_v32  ;;  %v5061_v39 = vpop.f32.mrb[127].mxu0  ;;  %v5425_v32 = vld [vmem:[%s6421_s5 + $0xb4] ss:$8 sps:$4 sm:$0xff]   ;;  %v5423_v35 = vld [vmem:[%s6421_s5 + $0xb0] ss:$8 sps:$4 sm:$0xff]  }
 0x846   :  { %v5401_v39 = vld [vmem:[%s6421_s5 + $0x234] ss:$8 sps:$4 sm:$0xff]  }
 0x84a   :  { %v3105_v40 = vpop.f32.mrb[128].mxu0 }
 0x84b   :  { %v5064_v55 = vpop.f32.mrb[129].mxu0 }
 0x84c   :  { %v3108_v56 = vpop.f32.mrb[130].mxu0 }
 0x84d   :  { %v3177_v57 = vpack.c.bf16 %v3108_v56, %v3105_v40  ;;  %v5065_v41 = vpop.f32.mrb[131].mxu0  ;;  %v5399_v56 = vld [vmem:[%s6421_s5 + $0x230] ss:$8 sps:$4 sm:$0xff]  }
 0x84e   :  { %v5402_v41 = vld [vmem:[%s6421_s5] ss:$8 sps:$4 sm:$0xff]  }
 0x84f   :  { %4404 = vmatmul.mubr.msk.bf16.vlgmr.msra.gmra.mrb[160].mxu0 %vm668_vm4, %v3177_v57  ;;  %v5404_v57 = vld [vmem:[%s6421_s5 + $0x4] ss:$8 sps:$4 sm:$0xff]  }
 0x850   :  { %4141 = vmatprep.mubr.f32.mxu0 %v5499_v1  ;;  %v5371_v1 = vld [vmem:[%s6421_s5 + $0x154] ss:$8 sps:$4 sm:$0xff]  }
 0x852   :  { %v6199_v59 = vpop.f32.mrb[132].mxu0 }
 0x853   :  { %v5068_v60 = vpop.f32.mrb[133].mxu0 }
 0x854   :  { %v6201_v62 = vpop.f32.mrb[134].mxu0  ;;  %v5407_v60 = vld [vmem:[%s6421_s5 + $0x14] ss:$8 sps:$4 sm:$0xff]  }
 0x855   :  { %v3273_v63 = vpack.c.bf16 %v6201_v62, %v6199_v59  ;;  %v5069_v61 = vpop.f32.mrb[135].mxu0  ;;  %v5443_v59 = vld [vmem:[%s6421_s5 + $0x134] ss:$8 sps:$4 sm:$0xff]   ;;  %v5441_v62 = vld [vmem:[%s6421_s5 + $0x130] ss:$8 sps:$4 sm:$0xff]  }
 0x856   :  { %v5405_v61 = vld [vmem:[%s6421_s5 + $0x10] ss:$8 sps:$4 sm:$0xff]  }
 0x85a   :  { %v3121_v0 = vpop.f32.mrb[136].mxu0 }
 0x85b   :  { %v5072_v30 = vpop.f32.mrb[137].mxu0 }
 0x85c   :  { %v3124_v34 = vpop.f32.mrb[138].mxu0  ;;  %v5408_v30 = vld [vmem:[%s6421_s5 + $0x20] ss:$8 sps:$4 sm:$0xff]  }
 0x85d   :  { %v3283_v54 = vpack.c.bf16 %v3124_v34, %v3121_v0  ;;  %v5073_v58 = vpop.f32.mrb[139].mxu0  ;;  %v5410_v0 = vld [vmem:[%s6421_s5 + $0x24] ss:$8 sps:$4 sm:$0xff]   ;;  %v5413_v34 = vld [vmem:[%s6421_s5 + $0x34] ss:$8 sps:$4 sm:$0xff]  }
 0x85e   :  { %v5419_v58 = vld [vmem:[%s6421_s5 + $0x94] ss:$8 sps:$4 sm:$0xff]  }
 0x85f   :  { %4429 = vmatmul.mubr.msk.bf16.vlgmr.msra.gmra.mrb[16].mxu1 %vm668_vm4, %v3283_v54  ;;  %v5416_v54 = vld [vmem:[%s6421_s5 + $0x84] ss:$8 sps:$4 sm:$0xff]  }
 0x860   :  { %3443 = vmatpush1.bf16.msra.mxu1 %v5366_v37  ;;  %3474 = vmatprep.mubr.bf16.mxu1 %v6425_v36  ;;  %v5411_v37 = vld [vmem:[%s6421_s5 + $0x30] ss:$8 sps:$4 sm:$0xff]  }
 0x861   :  { %3444 = vmatprep.subr.bf16.mxu1 %v5371_v1  ;;  %v5414_v1 = vld [vmem:[%s6421_s5 + $0x80] ss:$8 sps:$4 sm:$0xff]  }
 0x862   :  { %v6219_v16 = vpop.f32.mrb[140].mxu0 }
 0x863   :  { %v5076_v17 = vpop.f32.mrb[141].mxu0 }
 0x864   :  { %3445 = vmatpush1.bf16.msra.mxu1 %v5369_v31  ;;  %v6224_v19 = vpop.f32.mrb[142].mxu0  ;;  %v5417_v31 = vld [vmem:[%s6421_s5 + $0x90] ss:$8 sps:$4 sm:$0xff]   ;;  %v5420_v17 = vld [vmem:[%s6421_s5 + $0xa0] ss:$8 sps:$4 sm:$0xff]  }
 0x865   :  { %3446 = vmatprep.subr.bf16.mxu1 %v5374_v2  ;;  %v3379_v20 = vpack.c.bf16 %v6224_v19, %v6219_v16  ;;  %v5077_v21 = vpop.f32.mrb[143].mxu0  ;;  %v5422_v2 = vld [vmem:[%s6421_s5 + $0xa4] ss:$8 sps:$4 sm:$0xff]   ;;  %v5461_v16 = vld [vmem:[%s6421_s5 + $0x1b4] ss:$8 sps:$4 sm:$0xff]  }
 0x866   :  { %v5431_v21 = vld [vmem:[%s6421_s5 + $0x114] ss:$8 sps:$4 sm:$0xff]  }
 0x868   :  { %3447 = vmatpush1.bf16.msra.mxu1 %v5372_v18  ;;  %v5426_v18 = vld [vmem:[%s6421_s5 + $0x100] ss:$8 sps:$4 sm:$0xff]  }
 0x869   :  { %3448 = vmatprep.subr.bf16.mxu1 %v5377_v22  ;;  %v5429_v22 = vld [vmem:[%s6421_s5 + $0x110] ss:$8 sps:$4 sm:$0xff]  }
 0x86a   :  { %v3137_v25 = vpop.f32.mrb[144].mxu0 }
 0x86b   :  { %v5080_v26 = vpop.f32.mrb[145].mxu0 }
 0x86c   :  { %3449 = vmatpush1.bf16.msra.mxu1 %v5375_v23  ;;  %v3140_v27 = vpop.f32.mrb[146].mxu0  ;;  %v5437_v23 = vld [vmem:[%s6421_s5 + $0x124] ss:$8 sps:$4 sm:$0xff]   ;;  %v5455_v26 = vld [vmem:[%s6421_s5 + $0x194] ss:$8 sps:$4 sm:$0xff]  }
 0x86d   :  { %v3389_v43 = vpack.c.bf16 %v3140_v27, %v3137_v25  ;;  %3548 = vmatprep.subr.bf16.mxu1 %v5380_v24  ;;  %v5081_v45 = vpop.f32.mrb[147].mxu0  ;;  %v5435_v24 = vld [vmem:[%s6421_s5 + $0x120] ss:$8 sps:$4 sm:$0xff]   ;;  %v5453_v27 = vld [vmem:[%s6421_s5 + $0x190] ss:$8 sps:$4 sm:$0xff]  }
 0x86e   :  { %v5447_v25 = vld [vmem:[%s6421_s5 + $0x180] ss:$8 sps:$4 sm:$0xff]  }
 0x86f   :  { %4454 = vmatmul.mubr.msk.bf16.vlgmr.msra.gmra.mrb[16].mxu1 %vm668_vm4, %v3389_v43  ;;  %v5456_v43 = vld [vmem:[%s6421_s5 + $0x1a0] ss:$8 sps:$4 sm:$0xff]  }
 0x870   :  { %3549 = vmatpush1.bf16.msra.mxu1 %v5378_v42  ;;  %3580 = vmatprep.mubr.bf16.mxu1 %v6425_v36  ;;  %v5458_v42 = vld [vmem:[%s6421_s5 + $0x1a4] ss:$8 sps:$4 sm:$0xff]  }
 0x871   :  { %3550 = vmatprep.subr.bf16.mxu1 %v5383_v44 }
 0x872   :  { %v6251_v48 = vpop.f32.mrb[148].mxu0 }
 0x873   :  { %v5084_v49 = vpop.f32.mrb[149].mxu0 }
 0x874   :  { %3551 = vmatpush1.bf16.msra.mxu1 %v5381_v46  ;;  %v6256_v51 = vpop.f32.mrb[150].mxu0 }
 0x875   :  { %3552 = vmatprep.subr.bf16.mxu1 %v5386_v47  ;;  %v3485_v52 = vpack.c.bf16 %v6256_v51, %v6251_v48  ;;  %v5085_v53 = vpop.f32.mrb[151].mxu0 }
 0x878   :  { %3553 = vmatpush1.bf16.msra.mxu1 %v5384_v50  ;;  %v4052_v50 = vpop.permute.xlu0 %4051 }
 0x879   :  { %3554 = vmatprep.subr.bf16.mxu1 %v5389_v5 }
 0x87a   :  { %v3153_v8 = vpop.f32.mrb[152].mxu0 }
 0x87b   :  { %v5088_v9 = vpop.f32.mrb[153].mxu0 }
 0x87c   :  { %3555 = vmatpush1.bf16.msra.mxu1 %v5387_v6  ;;  %v3156_v10 = vpop.f32.mrb[154].mxu0  ;;  %v4057_v9 = vpop.permute.xlu1 %4056 }
 0x87d   :  { %v3495_v12 = vpack.c.bf16 %v3156_v10, %v3153_v8  ;;  %3644 = vmatprep.subr.bf16.mxu1 %v5392_v7  ;;  %v5089_v14 = vpop.f32.mrb[155].mxu0 }
 0x87f   :  { %4479 = vmatmul.mubr.msk.bf16.vlgmr.msra.gmra.mrb[16].mxu1 %vm668_vm4, %v3495_v12 }
 0x880   :  { %3645 = vmatpush1.bf16.msra.mxu1 %v5390_v11  ;;  %3676 = vmatprep.mubr.bf16.mxu1 %v6425_v36 }
 0x881   :  { %3646 = vmatprep.subr.bf16.mxu1 %v5395_v13 }
 0x882   :  { %v3161_v3 = vpop.f32.mrb[156].mxu0 }
 0x883   :  { %v5092_v4 = vpop.f32.mrb[157].mxu0 }
 0x884   :  { %3647 = vmatpush1.bf16.msra.mxu1 %v5393_v15  ;;  %v3164_v33 = vpop.f32.mrb[158].mxu0  ;;  %v4072_v4 = vpop.permute.xlu0 %4071 }
 0x885   :  { %3648 = vmatprep.subr.bf16.mxu1 %v5398_v28  ;;  %v3591_v40 = vpack.c.bf16 %v3164_v33, %v3161_v3  ;;  %v5093_v55 = vpop.f32.mrb[159].mxu0  ;;  %v4067_v3 = vld [vmem:[#allocation2 + $0x1d0] sm:$0x3f] }
 0x888   :  { %3649 = vmatpush1.bf16.msra.mxu1 %v5396_v29 }
 0x889   :  { %3650 = vmatprep.subr.bf16.mxu1 %v5401_v39 }
 0x88c   :  { %3651 = vmatpush1.bf16.msra.mxu1 %v5399_v56 }
 0x88d   :  { %3730 = vmatprep.subr.bf16.mxu1 %v5404_v57 }
 0x88f   :  { %4496 = vmatmul.mubr.msk.bf16.vlgmr.msra.gmra.mrb[16].mxu1 %vm668_vm4, %v3591_v40 }
 0x890   :  { %3731 = vmatpush1.bf16.msra.mxu1 %v5402_v41  ;;  %3762 = vmatprep.mubr.bf16.mxu1 %v6425_v36 }
 0x891   :  { %3732 = vmatprep.subr.bf16.mxu1 %v5407_v60 }
 0x894   :  { %3733 = vmatpush1.bf16.msra.mxu1 %v5405_v61 }
 0x895   :  { %3734 = vmatprep.subr.bf16.mxu1 %v5410_v0 }
 0x898   :  { %3735 = vmatpush1.bf16.msra.mxu1 %v5408_v30 }
 0x899   :  { %3736 = vmatprep.subr.bf16.mxu1 %v5413_v34 }
 0x89c   :  { %3737 = vmatpush1.bf16.msra.mxu1 %v5411_v37 }
 0x89d   :  { %3816 = vmatprep.subr.bf16.mxu1 %v5416_v54 }
 0x89f   :  { %4505 = vmatmul.mubr.msk.bf16.vlgmr.msra.gmra.mrb[16].mxu1 %vm668_vm4, %v3168_v38  ;;  %v5428_v38 = vld [vmem:[%s6421_s5 + $0x104] ss:$8 sps:$4 sm:$0xff]  }
 0x8a0   :  { %3817 = vmatpush1.bf16.msra.mxu1 %v5414_v1  ;;  %3848 = vmatprep.mubr.bf16.mxu1 %v6425_v36 }
 0x8a1   :  { %3818 = vmatprep.subr.bf16.mxu1 %v5419_v58 }
 0x8a4   :  { %3819 = vmatpush1.bf16.msra.mxu1 %v5417_v31 }
 0x8a5   :  { %3820 = vmatprep.subr.bf16.mxu1 %v5422_v2 }
 0x8a8   :  { %3821 = vmatpush1.bf16.msra.mxu1 %v5420_v17 }
 0x8a9   :  { %3822 = vmatprep.subr.bf16.mxu1 %v5425_v32 }
 0x8ac   :  { %3823 = vmatpush1.bf16.msra.mxu1 %v5423_v35 }
 0x8ad   :  { %3902 = vmatprep.subr.bf16.mxu1 %v5428_v38 }
 0x8af   :  { %4514 = vmatmul.mubr.msk.bf16.vlgmr.msra.gmra.mrb[16].mxu1 %vm668_vm4, %v3273_v63  ;;  %v5449_v63 = vld [vmem:[%s6421_s5 + $0x184] ss:$8 sps:$4 sm:$0xff]  }
 0x8b0   :  { %3903 = vmatpush1.bf16.msra.mxu1 %v5426_v18  ;;  %3934 = vmatprep.mubr.bf16.mxu1 %v6425_v36 }
 0x8b1   :  { %3904 = vmatprep.subr.bf16.mxu1 %v5431_v21 }
 0x8b4   :  { %3905 = vmatpush1.bf16.msra.mxu1 %v5429_v22 }
 0x8b5   :  { %3906 = vmatprep.subr.bf16.mxu1 %v5437_v23 }
 0x8b8   :  { %3907 = vmatpush1.bf16.msra.mxu1 %v5435_v24 }
 0x8b9   :  { %3908 = vmatprep.subr.bf16.mxu1 %v5443_v59 }
 0x8bc   :  { %3909 = vmatpush1.bf16.msra.mxu1 %v5441_v62 }
 0x8bd   :  { %3988 = vmatprep.subr.bf16.mxu1 %v5449_v63 }
 0x8bf   :  { %4523 = vmatmul.mubr.msk.bf16.vlgmr.msra.gmra.mrb[16].mxu1 %vm668_vm4, %v3379_v20 }
 0x8c0   :  { %3989 = vmatpush1.bf16.msra.mxu1 %v5447_v25  ;;  %4020 = vmatprep.mubr.bf16.mxu1 %v6425_v36  ;;  %v5459_v36 = vld [vmem:[%s6421_s5 + $0x1b0] ss:$8 sps:$4 sm:$0xff]  }
 0x8c1   :  { %3990 = vmatprep.subr.bf16.mxu1 %v5455_v26 }
 0x8c4   :  { %3991 = vmatpush1.bf16.msra.mxu1 %v5453_v27 }
 0x8c5   :  { %3992 = vmatprep.subr.bf16.mxu1 %v5458_v42 }
 0x8c8   :  { %3993 = vmatpush1.bf16.msra.mxu1 %v5456_v43 }
 0x8c9   :  { %3994 = vmatprep.subr.bf16.mxu1 %v5461_v16 }
 0x8cc   :  { %3995 = vmatpush1.bf16.msra.mxu1 %v5459_v36 }
 0x8cf   :  { %4532 = vmatmul.mubr.msk.bf16.vlgmr.msra.gmra.mrb[16].mxu1 %vm668_vm4, %v3485_v52 }
 0x922   :  { %v3264_v19 = vpop.f32.mrb[160].mxu0 }
 0x923   :  { %v3266_v20 = vpop.f32.mrb[161].mxu0 }
 0x924   :  { %v3268_v44 = vpop.f32.mrb[162].mxu0 }
 0x925   :  { %v3270_v45 = vpop.f32.mrb[163].mxu0 }
 0x9a2   :  { %v4022_v46 = vpop.f32.mrb[16].mxu1 }
 0x9a3   :  { %v5136_v47 = vadd.f32 %v4022_v46, %v3264_v19  ;;  %v4024_v49 = vpop.f32.mrb[17].mxu1 }
 0x9a4   :  { %v5137_v53 = vadd.f32 %v4024_v49, %v3266_v20  ;;  %v4026_v5 = vpop.f32.mrb[18].mxu1 }
 0x9a5   :  { %v4059_v6 = vadd.f32 %v5136_v47, %v4052_v50  ;;  %v5138_v7 = vadd.f32 %v4026_v5, %v3268_v44  ;;  %v4028_v8 = vpop.f32.mrb[19].mxu1 }
 0x9a6   :  { %v4060_v10 = vadd.f32 %v5137_v53, %v4052_v50  ;;  %v5139_v11 = vadd.f32 %v4028_v8, %v3270_v45 }
 0x9a7   :  { %v4061_v12 = vadd.f32 %v5138_v7, %v4057_v9  ;;  %v4063_v51 = vmax.f32 %v4059_v6, 0.0 }
 0x9a8   :  { %v4062_v48 = vadd.f32 %v5139_v11, %v4057_v9  ;;  %v4064_v13 = vmax.f32 %v4060_v10, 0.0 }
 0x9a9   :  { %v4065_v52 = vmax.f32 %v4061_v12, 0.0 }
 0x9aa   :  { %v4066_v14 = vmax.f32 %v4062_v48, 0.0 }
 0x9ab   :  { %v5134_v15 = vpack.c.bf16 %v4065_v52, %v4063_v51 }
 0x9ac   :  { %v5132_v28 = vpack.c.bf16 %v4066_v14, %v4064_v13 }
 0x9ae   :  { %5133 = vmatprep.subr.bf16.mxu0 %v5132_v28 }
 0x9af   :  { %5135 = vmatpush1.bf16.msra.mxu0 %v5134_v15 }
 0x9b2   :  { %4533 = vmatmul.mubr.msk.f32.vlgmr.msra.gmra.mrb[164].mxu0 %vm2344_vm6, %v4067_v3 }
 0xa85   :  { %v4143_v29 = vpop.f32.mrb[164].mxu0 }
 0xa86   :  { %v4144_v33 = vadd.f32 %v4143_v29, %v4072_v4  ;;  %v4145_v39 = vpop.f32.mrb[165].mxu0 }
 0xa87   :  { %v4146_v40 = vadd.f32 %v4145_v39, %v4072_v4 }
 0xa88   :  { %v4148_v55 = vsub.f32 0.0, %v4144_v33 }
 0xa89   :  { %v4149_v56 = vsub.f32 0.0, %v4146_v40 }
 0xa8a   :  { %v4150_v57 = vmul.f32 1.442695, %v4148_v55 }
 0xa8b   :  { %v4152_v41 = vmul.f32 1.442695, %v4149_v56 }
 0xa8c   :  { %5462 = vpow2.f32 %v4150_v57 }
 0xa8d   :  { %5464 = vpow2.f32 %v4152_v41 }
 0xa96   :  { %v5463_v60 = vpop.eup %5462 }
 0xa97   :  { %v5465_v61 = vpop.eup %5464  ;;  %v4154_v0 = vadd.f32 1.0, %v5463_v60 }
 0xa98   :  { %v4155_v30 = vadd.f32 1.0, %v5465_v61 }
 0xa99   :  { %5466 = vrcp.f32 %v4154_v0 }
 0xa9a   :  { %5468 = vrcp.f32 %v4155_v30 }
 0xaa3   :  { %v5467_v34 = vpop.eup %5466 }
 0xaa4   :  { %v5469_v37 = vpop.eup %5468  ;;  %4158 = vst [vmem:[%s6422_s6] sm:$0x3f] %v5467_v34 }
 0xaa5   :  { %4159 = vst [vmem:[%s6422_s6 + $0x8] sm:$0x3f] %v5469_v37 }
 0xaa6   :  { %4164 = vsyncpa [#allocation3], 1 }

</bundles_post_ra>
